<compile_context>
chip_gen: v5e
topology: v5e:2x2
jax: 0.10.0
libtpu: 0.0.40
codegen_flags: <defaults>
</compile_context>

<pallas_src>
import functools
import math

import jax
import jax.numpy as jnp
from jax import lax
from jax.experimental import pallas as pl
from jax.experimental.pallas import tpu as pltpu

# ----------------------------- model config --------------------------------
BATCH = 2
SEQ = 8
VOCAB = 128
D_MODEL = 32
NUM_HEADS = 4
HEAD_DIM = D_MODEL // NUM_HEADS
FFN_DIM = 64
NUM_LAYERS = 2
STYLE_DIM = 8          # must divide D_MODEL (as in the PyTorch repeat)
LN_EPS = 1e-5


# ----------------------------- Pallas kernel --------------------------------
def _layernorm(h, scale, bias):
    mu = jnp.mean(h, axis=-1, keepdims=True)
    var = jnp.mean((h - mu) ** 2, axis=-1, keepdims=True)
    return (h - mu) * lax.rsqrt(var + LN_EPS) * scale + bias


def encoder_kernel(x_ref, mask_ref,
                   ln1_s_ref, ln1_b_ref, wqkv_ref, bqkv_ref, wo_ref, bo_ref,
                   ln2_s_ref, ln2_b_ref, w1_ref, b1_ref, w2_ref, b2_ref,
                   fln_s_ref, fln_b_ref,
                   o_ref):
    """Fused Pegasus-style encoder: all layers + final LN in one invocation.

    x_ref is (B*S, D) with batch folded into the matmul row dimension; the
    per-batch attention mask is (B, 1, S).  All weights live in VMEM for the
    whole call (stacked along a leading layer axis).
    """
    B, _, S = mask_ref.shape
    x = x_ref[...]                                         # (R, D) = (B*S, D)
    # additive key mask, computed once (hoisted out of the layer loop)
    neg = (1.0 - mask_ref[...]) * jnp.float32(-1e9)        # (B, 1, S)

    for layer in range(NUM_LAYERS):                        # static unroll
        # ---- self-attention block (pre layernorm) ----
        h = _layernorm(x, ln1_s_ref[layer], ln1_b_ref[layer])
        # fused QKV projection; 1/sqrt(head_dim) already folded into Wq/bq
        qkv = jnp.dot(h, wqkv_ref[layer],
                      preferred_element_type=jnp.float32) + bqkv_ref[layer]
        wo_l = wo_ref[layer]                               # (D, D)
        attn = jnp.zeros_like(x)                           # (R, D) accumulator
        for hh in range(NUM_HEADS):                        # static unroll
            lo = hh * HEAD_DIM
            qh = qkv[:, lo:lo + HEAD_DIM].reshape(B, S, HEAD_DIM)
            kh = qkv[:, D_MODEL + lo:D_MODEL + lo + HEAD_DIM].reshape(
                B, S, HEAD_DIM)
            vh = qkv[:, 2 * D_MODEL + lo:2 * D_MODEL + lo + HEAD_DIM].reshape(
                B, S, HEAD_DIM)
            # scores: contract last dims directly (no transpose materialized)
            scores = lax.dot_general(
                qh, kh, (((2,), (2,)), ((0,), (0,))),
                preferred_element_type=jnp.float32) + neg  # (B, S, S)
            # explicit softmax: max-subtract + exp + EUP reciprocal
            m = jnp.max(scores, axis=-1, keepdims=True)
            p = jnp.exp(scores - m)
            denom = jnp.sum(p, axis=-1, keepdims=True)
            p = p * pl.reciprocal(denom, approx=True)
            oh = lax.dot_general(
                p, vh, (((2,), (1,)), ((0,), (0,))),
                preferred_element_type=jnp.float32)        # (B, S, hd)
            # per-head output projection accumulated into (R, D) -- no concat
            attn = attn + jnp.dot(oh.reshape(B * S, HEAD_DIM),
                                  wo_l[lo:lo + HEAD_DIM, :],
                                  preferred_element_type=jnp.float32)
        x = x + attn + bo_ref[layer]

        # ---- feed-forward block (pre layernorm) ----
        h = _layernorm(x, ln2_s_ref[layer], ln2_b_ref[layer])
        h = jnp.dot(h, w1_ref[layer],
                    preferred_element_type=jnp.float32) + b1_ref[layer]
        h = jnp.maximum(h, 0.0)                            # ReLU (Pegasus)
        h = jnp.dot(h, w2_ref[layer],
                    preferred_element_type=jnp.float32) + b2_ref[layer]
        x = x + h

    # final encoder layernorm, stored once
    o_ref[...] = _layernorm(x, fln_s_ref[...], fln_b_ref[...])


# ----------------------------- pallas_call wrapper ---------------------------
def encoder_forward(x2d, mask_f, p):
    """Single fused pallas_call: (B*S, D) in -> (B*S, D) out."""
    R, D = x2d.shape
    vmem = pl.BlockSpec(memory_space=pltpu.MemorySpace.VMEM)
    return pl.pallas_call(
        encoder_kernel,
        out_shape=jax.ShapeDtypeStruct((R, D), jnp.float32),
        in_specs=[vmem] * 16,
        out_specs=vmem,
    )(x2d, mask_f,
      p["ln1_s"], p["ln1_b"], p["wqkv"], p["bqkv"], p["wo"], p["bo"],
      p["ln2_s"], p["ln2_b"], p["w1"], p["b1"], p["w2"], p["b2"],
      p["final_ln_s"], p["final_ln_b"])


# ----------------------------- parameters & glue ----------------------------
def sinusoidal_positions(seq_len, dim):
    pos = jnp.arange(seq_len, dtype=jnp.float32)[:, None]
    i = jnp.arange(dim // 2, dtype=jnp.float32)[None, :]
    angle = pos / jnp.power(10000.0, 2.0 * i / dim)
    return jnp.concatenate([jnp.sin(angle), jnp.cos(angle)], axis=-1)  # (S, D)


def init_params(key):
    def nrm(k, shape, std=0.02):
        return (std * jax.random.normal(k, shape)).astype(jnp.float32)

    keys = jax.random.split(key, 1 + NUM_LAYERS)
    qscale = jnp.float32(1.0 / math.sqrt(HEAD_DIM))

    ln1_s, ln1_b, wqkv, bqkv, wo, bo = [], [], [], [], [], []
    ln2_s, ln2_b, w1, b1, w2, b2 = [], [], [], [], [], []
    for l in range(NUM_LAYERS):
        lk = jax.random.split(keys[1 + l], 6)
        wq = nrm(lk[0], (D_MODEL, D_MODEL)) * qscale      # fold 1/sqrt(hd)
        bq = jnp.zeros((1, D_MODEL), jnp.float32) * qscale
        wk = nrm(lk[1], (D_MODEL, D_MODEL))
        bk = jnp.zeros((1, D_MODEL), jnp.float32)
        wv = nrm(lk[2], (D_MODEL, D_MODEL))
        bv = jnp.zeros((1, D_MODEL), jnp.float32)
        ln1_s.append(jnp.ones((1, D_MODEL), jnp.float32))
        ln1_b.append(jnp.zeros((1, D_MODEL), jnp.float32))
        wqkv.append(jnp.concatenate([wq, wk, wv], axis=1))   # (D, 3D)
        bqkv.append(jnp.concatenate([bq, bk, bv], axis=1))   # (1, 3D)
        wo.append(nrm(lk[3], (D_MODEL, D_MODEL)))
        bo.append(jnp.zeros((1, D_MODEL), jnp.float32))
        ln2_s.append(jnp.ones((1, D_MODEL), jnp.float32))
        ln2_b.append(jnp.zeros((1, D_MODEL), jnp.float32))
        w1.append(nrm(lk[4], (D_MODEL, FFN_DIM)))
        b1.append(jnp.zeros((1, FFN_DIM), jnp.float32))
        w2.append(nrm(lk[5], (FFN_DIM, D_MODEL)))
        b2.append(jnp.zeros((1, D_MODEL), jnp.float32))

    stack = lambda xs: jnp.stack(xs, axis=0)
    return {
        "embed": nrm(keys[0], (VOCAB, D_MODEL)),
        "ln1_s": stack(ln1_s), "ln1_b": stack(ln1_b),
        "wqkv": stack(wqkv), "bqkv": stack(bqkv),
        "wo": stack(wo), "bo": stack(bo),
        "ln2_s": stack(ln2_s), "ln2_b": stack(ln2_b),
        "w1": stack(w1), "b1": stack(b1),
        "w2": stack(w2), "b2": stack(b2),
        "final_ln_s": jnp.ones((1, D_MODEL), jnp.float32),
        "final_ln_b": jnp.zeros((1, D_MODEL), jnp.float32),
    }


@functools.partial(jax.jit, static_argnames=("use_style",))
def summarizer_encode(params, input_ids, attention_mask,
                      style_code=None, style_scale=1.0, use_style=True):
    """Mirrors Summarizer.encode(): encoder forward + optional style prepend."""
    B, S = input_ids.shape
    # token embedding (scaled, Pegasus convention) + sinusoidal positions (glue)
    x = params["embed"][input_ids] * jnp.float32(math.sqrt(D_MODEL))
    x = x + sinusoidal_positions(S, D_MODEL)[None, :, :]
    x2d = x.reshape(B * S, D_MODEL).astype(jnp.float32)
    mask_f = attention_mask.astype(jnp.float32).reshape(B, 1, S)

    y = encoder_forward(x2d, mask_f, params)            # fused Pallas hot path
    y = y.reshape(B, S, D_MODEL)

    new_mask = attention_mask
    if use_style and style_code is not None:
        rep = D_MODEL // style_code.shape[1]
        style_rep = jnp.tile(style_code, (1, rep))      # (B, D_MODEL)
        y = jnp.concatenate([style_rep[:, None, :] * style_scale, y], axis=1)
        new_mask = jnp.concatenate(
            [jnp.ones_like(attention_mask[:, :1]), attention_mask], axis=1)
    return y, new_mask


# ----------------------------------- main -----------------------------------
if __name__ == "__main__":
    key = jax.random.PRNGKey(0)
    k_param, k_ids, k_style = jax.random.split(key, 3)

    params = init_params(k_param)

    input_ids = jax.random.randint(k_ids, (BATCH, SEQ), 0, VOCAB, dtype=jnp.int32)
    attention_mask = jnp.ones((BATCH, SEQ), jnp.int32)
    attention_mask = attention_mask.at[1, SEQ - 2:].set(0)   # padding in row 1

    style_code = jax.random.normal(k_style, (BATCH, STYLE_DIM), jnp.float32)
    scales = (1.0, 0.5)                                      # only scales[1] used

    hidden, new_mask = summarizer_encode(
        params, input_ids, attention_mask,
        style_code=style_code, style_scale=scales[1], use_style=True)
    hidden = jax.block_until_ready(hidden)
    new_mask = jax.block_until_ready(new_mask)

    assert hidden.shape == (BATCH, SEQ + 1, D_MODEL), hidden.shape
    assert new_mask.shape == (BATCH, SEQ + 1), new_mask.shape
    assert bool(jnp.all(jnp.isfinite(hidden)))

    print("KERNEL_OK")
</pallas_src>

<mosaic_0001>
module attributes {stable_mosaic.version = 11 : i64} {
  func.func @encoder_kernel(%arg0: memref<16x32xf32, #tpu.memory_space<vmem>>, %arg1: memref<2x1x8xf32, #tpu.memory_space<vmem>>, %arg2: memref<2x1x32xf32, #tpu.memory_space<vmem>>, %arg3: memref<2x1x32xf32, #tpu.memory_space<vmem>>, %arg4: memref<2x32x96xf32, #tpu.memory_space<vmem>>, %arg5: memref<2x1x96xf32, #tpu.memory_space<vmem>>, %arg6: memref<2x32x32xf32, #tpu.memory_space<vmem>>, %arg7: memref<2x1x32xf32, #tpu.memory_space<vmem>>, %arg8: memref<2x1x32xf32, #tpu.memory_space<vmem>>, %arg9: memref<2x1x32xf32, #tpu.memory_space<vmem>>, %arg10: memref<2x32x64xf32, #tpu.memory_space<vmem>>, %arg11: memref<2x1x64xf32, #tpu.memory_space<vmem>>, %arg12: memref<2x64x32xf32, #tpu.memory_space<vmem>>, %arg13: memref<2x1x32xf32, #tpu.memory_space<vmem>>, %arg14: memref<1x32xf32, #tpu.memory_space<vmem>>, %arg15: memref<1x32xf32, #tpu.memory_space<vmem>>, %arg16: memref<16x32xf32, #tpu.memory_space<vmem>>) attributes {dimension_semantics = [], scalar_prefetch = 0 : i64, scratch_operands = 0 : i64, tpu.core_type = #tpu.core_type<tc>} {
    %c0 = arith.constant 0 : index
    %c0_0 = arith.constant 0 : index
    %0 = vector.load %arg0[%c0, %c0_0] : memref<16x32xf32, #tpu.memory_space<vmem>>, vector<16x32xf32>
    %c0_1 = arith.constant 0 : index
    %c0_2 = arith.constant 0 : index
    %c0_3 = arith.constant 0 : index
    %1 = vector.load %arg1[%c0_1, %c0_2, %c0_3] : memref<2x1x8xf32, #tpu.memory_space<vmem>>, vector<2x1x8xf32>
    %cst = arith.constant 1.000000e+00 : f32
    %2 = vector.broadcast %cst : f32 to vector<2x1x8xf32>
    %3 = arith.subf %2, %1 : vector<2x1x8xf32>
    %cst_4 = arith.constant -1.000000e+09 : f32
    %4 = vector.broadcast %cst_4 : f32 to vector<2x1x8xf32>
    %5 = arith.mulf %3, %4 : vector<2x1x8xf32>
    %c0_5 = arith.constant 0 : index
    %c0_6 = arith.constant 0 : index
    %c0_7 = arith.constant 0 : index
    %6 = vector.load %arg2[%c0_5, %c0_6, %c0_7] : memref<2x1x32xf32, #tpu.memory_space<vmem>>, vector<1x1x32xf32>
    %7 = vector.shape_cast %6 : vector<1x1x32xf32> to vector<1x32xf32>
    %c0_8 = arith.constant 0 : index
    %c0_9 = arith.constant 0 : index
    %c0_10 = arith.constant 0 : index
    %8 = vector.load %arg3[%c0_8, %c0_9, %c0_10] : memref<2x1x32xf32, #tpu.memory_space<vmem>>, vector<1x1x32xf32>
    %9 = vector.shape_cast %8 : vector<1x1x32xf32> to vector<1x32xf32>
    %cst_11 = arith.constant dense<0.000000e+00> : vector<16xf32>
    %10 = vector.multi_reduction <add>, %0, %cst_11 [1] : vector<16x32xf32> to vector<16xf32>
    %11 = vector.shape_cast %10 : vector<16xf32> to vector<16x1xf32>
    %cst_12 = arith.constant 3.200000e+01 : f32
    %12 = vector.broadcast %cst_12 : f32 to vector<16x1xf32>
    %13 = arith.divf %11, %12 : vector<16x1xf32>
    %14 = vector.broadcast %13 : vector<16x1xf32> to vector<16x32xf32>
    %15 = arith.subf %0, %14 : vector<16x32xf32>
    %16 = arith.mulf %15, %15 : vector<16x32xf32>
    %cst_13 = arith.constant dense<0.000000e+00> : vector<16xf32>
    %17 = vector.multi_reduction <add>, %16, %cst_13 [1] : vector<16x32xf32> to vector<16xf32>
    %18 = vector.shape_cast %17 : vector<16xf32> to vector<16x1xf32>
    %cst_14 = arith.constant 3.200000e+01 : f32
    %19 = vector.broadcast %cst_14 : f32 to vector<16x1xf32>
    %20 = arith.divf %18, %19 : vector<16x1xf32>
    %21 = vector.broadcast %13 : vector<16x1xf32> to vector<16x32xf32>
    %22 = arith.subf %0, %21 : vector<16x32xf32>
    %cst_15 = arith.constant 9.99999974E-6 : f32
    %23 = vector.broadcast %cst_15 : f32 to vector<16x1xf32>
    %24 = arith.addf %20, %23 : vector<16x1xf32>
    %25 = math.rsqrt %24 : vector<16x1xf32>
    %26 = vector.broadcast %25 : vector<16x1xf32> to vector<16x32xf32>
    %27 = arith.mulf %22, %26 : vector<16x32xf32>
    %28 = vector.broadcast %7 : vector<1x32xf32> to vector<16x32xf32>
    %29 = arith.mulf %27, %28 : vector<16x32xf32>
    %30 = vector.broadcast %9 : vector<1x32xf32> to vector<16x32xf32>
    %31 = arith.addf %29, %30 : vector<16x32xf32>
    %c0_16 = arith.constant 0 : index
    %c0_17 = arith.constant 0 : index
    %c0_18 = arith.constant 0 : index
    %32 = vector.load %arg4[%c0_16, %c0_17, %c0_18] : memref<2x32x96xf32, #tpu.memory_space<vmem>>, vector<1x32x96xf32>
    %33 = vector.shape_cast %32 : vector<1x32x96xf32> to vector<32x96xf32>
    %cst_19 = arith.constant dense<0.000000e+00> : vector<16x96xf32>
    %34 = tpu.matmul %31, %33, %cst_19 {dimension_numbers = #tpu.dot_dimension_numbers<[1], [0], [0], [1], [0, 0, 1, 1], [], []>} : vector<16x32xf32>, vector<32x96xf32>, vector<16x96xf32> -> vector<16x96xf32>
    %c0_20 = arith.constant 0 : index
    %c0_21 = arith.constant 0 : index
    %c0_22 = arith.constant 0 : index
    %35 = vector.load %arg5[%c0_20, %c0_21, %c0_22] : memref<2x1x96xf32, #tpu.memory_space<vmem>>, vector<1x1x96xf32>
    %36 = vector.shape_cast %35 : vector<1x1x96xf32> to vector<1x96xf32>
    %37 = vector.broadcast %36 : vector<1x96xf32> to vector<16x96xf32>
    %38 = arith.addf %34, %37 : vector<16x96xf32>
    %c0_23 = arith.constant 0 : index
    %c0_24 = arith.constant 0 : index
    %c0_25 = arith.constant 0 : index
    %39 = vector.load %arg6[%c0_23, %c0_24, %c0_25] : memref<2x32x32xf32, #tpu.memory_space<vmem>>, vector<1x32x32xf32>
    %40 = vector.shape_cast %39 : vector<1x32x32xf32> to vector<32x32xf32>
    %cst_26 = arith.constant 0.000000e+00 : f32
    %41 = vector.broadcast %cst_26 : f32 to vector<16x32xf32>
    %42 = vector.extract_strided_slice %38 {offsets = [0, 0], sizes = [16, 8], strides = [1, 1]} : vector<16x96xf32> to vector<16x8xf32>
    %43 = vector.shape_cast %42 : vector<16x8xf32> to vector<2x8x8xf32>
    %44 = vector.extract_strided_slice %38 {offsets = [0, 32], sizes = [16, 8], strides = [1, 1]} : vector<16x96xf32> to vector<16x8xf32>
    %45 = vector.shape_cast %44 : vector<16x8xf32> to vector<2x8x8xf32>
    %46 = vector.extract_strided_slice %38 {offsets = [0, 64], sizes = [16, 8], strides = [1, 1]} : vector<16x96xf32> to vector<16x8xf32>
    %47 = vector.shape_cast %46 : vector<16x8xf32> to vector<2x8x8xf32>
    %cst_27 = arith.constant dense<0.000000e+00> : vector<2x8x8xf32>
    %48 = tpu.matmul %43, %45, %cst_27 {dimension_numbers = #tpu.dot_dimension_numbers<[2], [2], [1], [1], [0, 0, 0, 1, 1, 1], [0], [0]>} : vector<2x8x8xf32>, vector<2x8x8xf32>, vector<2x8x8xf32> -> vector<2x8x8xf32>
    %49 = vector.broadcast %5 : vector<2x1x8xf32> to vector<2x8x8xf32>
    %50 = arith.addf %48, %49 : vector<2x8x8xf32>
    %cst_28 = arith.constant dense<0xFF800000> : vector<2x8xf32>
    %51 = vector.multi_reduction <maximumf>, %50, %cst_28 [2] : vector<2x8x8xf32> to vector<2x8xf32>
    %52 = vector.shape_cast %51 : vector<2x8xf32> to vector<2x8x1xf32>
    %53 = vector.broadcast %52 : vector<2x8x1xf32> to vector<2x8x8xf32>
    %54 = arith.subf %50, %53 : vector<2x8x8xf32>
    %55 = math.exp %54 : vector<2x8x8xf32>
    %cst_29 = arith.constant dense<0.000000e+00> : vector<2x8xf32>
    %56 = vector.multi_reduction <add>, %55, %cst_29 [2] : vector<2x8x8xf32> to vector<2x8xf32>
    %57 = vector.shape_cast %56 : vector<2x8xf32> to vector<2x8x1xf32>
    %58 = tpu.reciprocal %57 {approx = true} : vector<2x8x1xf32> -> vector<2x8x1xf32>
    %59 = vector.broadcast %58 : vector<2x8x1xf32> to vector<2x8x8xf32>
    %60 = arith.mulf %55, %59 : vector<2x8x8xf32>
    %cst_30 = arith.constant dense<0.000000e+00> : vector<2x8x8xf32>
    %61 = tpu.matmul %60, %47, %cst_30 {dimension_numbers = #tpu.dot_dimension_numbers<[2], [1], [1], [2], [0, 0, 0, 1, 1, 2], [0], [0]>} : vector<2x8x8xf32>, vector<2x8x8xf32>, vector<2x8x8xf32> -> vector<2x8x8xf32>
    %62 = vector.shape_cast %61 : vector<2x8x8xf32> to vector<16x8xf32>
    %63 = vector.extract_strided_slice %40 {offsets = [0, 0], sizes = [8, 32], strides = [1, 1]} : vector<32x32xf32> to vector<8x32xf32>
    %cst_31 = arith.constant dense<0.000000e+00> : vector<16x32xf32>
    %64 = tpu.matmul %62, %63, %cst_31 {dimension_numbers = #tpu.dot_dimension_numbers<[1], [0], [0], [1], [0, 0, 1, 1], [], []>} : vector<16x8xf32>, vector<8x32xf32>, vector<16x32xf32> -> vector<16x32xf32>
    %65 = arith.addf %41, %64 : vector<16x32xf32>
    %66 = vector.extract_strided_slice %38 {offsets = [0, 8], sizes = [16, 8], strides = [1, 1]} : vector<16x96xf32> to vector<16x8xf32>
    %67 = vector.shape_cast %66 : vector<16x8xf32> to vector<2x8x8xf32>
    %68 = vector.extract_strided_slice %38 {offsets = [0, 40], sizes = [16, 8], strides = [1, 1]} : vector<16x96xf32> to vector<16x8xf32>
    %69 = vector.shape_cast %68 : vector<16x8xf32> to vector<2x8x8xf32>
    %70 = vector.extract_strided_slice %38 {offsets = [0, 72], sizes = [16, 8], strides = [1, 1]} : vector<16x96xf32> to vector<16x8xf32>
    %71 = vector.shape_cast %70 : vector<16x8xf32> to vector<2x8x8xf32>
    %cst_32 = arith.constant dense<0.000000e+00> : vector<2x8x8xf32>
    %72 = tpu.matmul %67, %69, %cst_32 {dimension_numbers = #tpu.dot_dimension_numbers<[2], [2], [1], [1], [0, 0, 0, 1, 1, 1], [0], [0]>} : vector<2x8x8xf32>, vector<2x8x8xf32>, vector<2x8x8xf32> -> vector<2x8x8xf32>
    %73 = vector.broadcast %5 : vector<2x1x8xf32> to vector<2x8x8xf32>
    %74 = arith.addf %72, %73 : vector<2x8x8xf32>
    %cst_33 = arith.constant dense<0xFF800000> : vector<2x8xf32>
    %75 = vector.multi_reduction <maximumf>, %74, %cst_33 [2] : vector<2x8x8xf32> to vector<2x8xf32>
    %76 = vector.shape_cast %75 : vector<2x8xf32> to vector<2x8x1xf32>
    %77 = vector.broadcast %76 : vector<2x8x1xf32> to vector<2x8x8xf32>
    %78 = arith.subf %74, %77 : vector<2x8x8xf32>
    %79 = math.exp %78 : vector<2x8x8xf32>
    %cst_34 = arith.constant dense<0.000000e+00> : vector<2x8xf32>
    %80 = vector.multi_reduction <add>, %79, %cst_34 [2] : vector<2x8x8xf32> to vector<2x8xf32>
    %81 = vector.shape_cast %80 : vector<2x8xf32> to vector<2x8x1xf32>
    %82 = tpu.reciprocal %81 {approx = true} : vector<2x8x1xf32> -> vector<2x8x1xf32>
    %83 = vector.broadcast %82 : vector<2x8x1xf32> to vector<2x8x8xf32>
    %84 = arith.mulf %79, %83 : vector<2x8x8xf32>
    %cst_35 = arith.constant dense<0.000000e+00> : vector<2x8x8xf32>
    %85 = tpu.matmul %84, %71, %cst_35 {dimension_numbers = #tpu.dot_dimension_numbers<[2], [1], [1], [2], [0, 0, 0, 1, 1, 2], [0], [0]>} : vector<2x8x8xf32>, vector<2x8x8xf32>, vector<2x8x8xf32> -> vector<2x8x8xf32>
    %86 = vector.shape_cast %85 : vector<2x8x8xf32> to vector<16x8xf32>
    %87 = vector.extract_strided_slice %40 {offsets = [8, 0], sizes = [8, 32], strides = [1, 1]} : vector<32x32xf32> to vector<8x32xf32>
    %cst_36 = arith.constant dense<0.000000e+00> : vector<16x32xf32>
    %88 = tpu.matmul %86, %87, %cst_36 {dimension_numbers = #tpu.dot_dimension_numbers<[1], [0], [0], [1], [0, 0, 1, 1], [], []>} : vector<16x8xf32>, vector<8x32xf32>, vector<16x32xf32> -> vector<16x32xf32>
    %89 = arith.addf %65, %88 : vector<16x32xf32>
    %90 = vector.extract_strided_slice %38 {offsets = [0, 16], sizes = [16, 8], strides = [1, 1]} : vector<16x96xf32> to vector<16x8xf32>
    %91 = vector.shape_cast %90 : vector<16x8xf32> to vector<2x8x8xf32>
    %92 = vector.extract_strided_slice %38 {offsets = [0, 48], sizes = [16, 8], strides = [1, 1]} : vector<16x96xf32> to vector<16x8xf32>
    %93 = vector.shape_cast %92 : vector<16x8xf32> to vector<2x8x8xf32>
    %94 = vector.extract_strided_slice %38 {offsets = [0, 80], sizes = [16, 8], strides = [1, 1]} : vector<16x96xf32> to vector<16x8xf32>
    %95 = vector.shape_cast %94 : vector<16x8xf32> to vector<2x8x8xf32>
    %cst_37 = arith.constant dense<0.000000e+00> : vector<2x8x8xf32>
    %96 = tpu.matmul %91, %93, %cst_37 {dimension_numbers = #tpu.dot_dimension_numbers<[2], [2], [1], [1], [0, 0, 0, 1, 1, 1], [0], [0]>} : vector<2x8x8xf32>, vector<2x8x8xf32>, vector<2x8x8xf32> -> vector<2x8x8xf32>
    %97 = vector.broadcast %5 : vector<2x1x8xf32> to vector<2x8x8xf32>
    %98 = arith.addf %96, %97 : vector<2x8x8xf32>
    %cst_38 = arith.constant dense<0xFF800000> : vector<2x8xf32>
    %99 = vector.multi_reduction <maximumf>, %98, %cst_38 [2] : vector<2x8x8xf32> to vector<2x8xf32>
    %100 = vector.shape_cast %99 : vector<2x8xf32> to vector<2x8x1xf32>
    %101 = vector.broadcast %100 : vector<2x8x1xf32> to vector<2x8x8xf32>
    %102 = arith.subf %98, %101 : vector<2x8x8xf32>
    %103 = math.exp %102 : vector<2x8x8xf32>
    %cst_39 = arith.constant dense<0.000000e+00> : vector<2x8xf32>
    %104 = vector.multi_reduction <add>, %103, %cst_39 [2] : vector<2x8x8xf32> to vector<2x8xf32>
    %105 = vector.shape_cast %104 : vector<2x8xf32> to vector<2x8x1xf32>
    %106 = tpu.reciprocal %105 {approx = true} : vector<2x8x1xf32> -> vector<2x8x1xf32>
    %107 = vector.broadcast %106 : vector<2x8x1xf32> to vector<2x8x8xf32>
    %108 = arith.mulf %103, %107 : vector<2x8x8xf32>
    %cst_40 = arith.constant dense<0.000000e+00> : vector<2x8x8xf32>
    %109 = tpu.matmul %108, %95, %cst_40 {dimension_numbers = #tpu.dot_dimension_numbers<[2], [1], [1], [2], [0, 0, 0, 1, 1, 2], [0], [0]>} : vector<2x8x8xf32>, vector<2x8x8xf32>, vector<2x8x8xf32> -> vector<2x8x8xf32>
    %110 = vector.shape_cast %109 : vector<2x8x8xf32> to vector<16x8xf32>
    %111 = vector.extract_strided_slice %40 {offsets = [16, 0], sizes = [8, 32], strides = [1, 1]} : vector<32x32xf32> to vector<8x32xf32>
    %cst_41 = arith.constant dense<0.000000e+00> : vector<16x32xf32>
    %112 = tpu.matmul %110, %111, %cst_41 {dimension_numbers = #tpu.dot_dimension_numbers<[1], [0], [0], [1], [0, 0, 1, 1], [], []>} : vector<16x8xf32>, vector<8x32xf32>, vector<16x32xf32> -> vector<16x32xf32>
    %113 = arith.addf %89, %112 : vector<16x32xf32>
    %114 = vector.extract_strided_slice %38 {offsets = [0, 24], sizes = [16, 8], strides = [1, 1]} : vector<16x96xf32> to vector<16x8xf32>
    %115 = vector.shape_cast %114 : vector<16x8xf32> to vector<2x8x8xf32>
    %116 = vector.extract_strided_slice %38 {offsets = [0, 56], sizes = [16, 8], strides = [1, 1]} : vector<16x96xf32> to vector<16x8xf32>
    %117 = vector.shape_cast %116 : vector<16x8xf32> to vector<2x8x8xf32>
    %118 = vector.extract_strided_slice %38 {offsets = [0, 88], sizes = [16, 8], strides = [1, 1]} : vector<16x96xf32> to vector<16x8xf32>
    %119 = vector.shape_cast %118 : vector<16x8xf32> to vector<2x8x8xf32>
    %cst_42 = arith.constant dense<0.000000e+00> : vector<2x8x8xf32>
    %120 = tpu.matmul %115, %117, %cst_42 {dimension_numbers = #tpu.dot_dimension_numbers<[2], [2], [1], [1], [0, 0, 0, 1, 1, 1], [0], [0]>} : vector<2x8x8xf32>, vector<2x8x8xf32>, vector<2x8x8xf32> -> vector<2x8x8xf32>
    %121 = vector.broadcast %5 : vector<2x1x8xf32> to vector<2x8x8xf32>
    %122 = arith.addf %120, %121 : vector<2x8x8xf32>
    %cst_43 = arith.constant dense<0xFF800000> : vector<2x8xf32>
    %123 = vector.multi_reduction <maximumf>, %122, %cst_43 [2] : vector<2x8x8xf32> to vector<2x8xf32>
    %124 = vector.shape_cast %123 : vector<2x8xf32> to vector<2x8x1xf32>
    %125 = vector.broadcast %124 : vector<2x8x1xf32> to vector<2x8x8xf32>
    %126 = arith.subf %122, %125 : vector<2x8x8xf32>
    %127 = math.exp %126 : vector<2x8x8xf32>
    %cst_44 = arith.constant dense<0.000000e+00> : vector<2x8xf32>
    %128 = vector.multi_reduction <add>, %127, %cst_44 [2] : vector<2x8x8xf32> to vector<2x8xf32>
    %129 = vector.shape_cast %128 : vector<2x8xf32> to vector<2x8x1xf32>
    %130 = tpu.reciprocal %129 {approx = true} : vector<2x8x1xf32> -> vector<2x8x1xf32>
    %131 = vector.broadcast %130 : vector<2x8x1xf32> to vector<2x8x8xf32>
    %132 = arith.mulf %127, %131 : vector<2x8x8xf32>
    %cst_45 = arith.constant dense<0.000000e+00> : vector<2x8x8xf32>
    %133 = tpu.matmul %132, %119, %cst_45 {dimension_numbers = #tpu.dot_dimension_numbers<[2], [1], [1], [2], [0, 0, 0, 1, 1, 2], [0], [0]>} : vector<2x8x8xf32>, vector<2x8x8xf32>, vector<2x8x8xf32> -> vector<2x8x8xf32>
    %134 = vector.shape_cast %133 : vector<2x8x8xf32> to vector<16x8xf32>
    %135 = vector.extract_strided_slice %40 {offsets = [24, 0], sizes = [8, 32], strides = [1, 1]} : vector<32x32xf32> to vector<8x32xf32>
    %cst_46 = arith.constant dense<0.000000e+00> : vector<16x32xf32>
    %136 = tpu.matmul %134, %135, %cst_46 {dimension_numbers = #tpu.dot_dimension_numbers<[1], [0], [0], [1], [0, 0, 1, 1], [], []>} : vector<16x8xf32>, vector<8x32xf32>, vector<16x32xf32> -> vector<16x32xf32>
    %137 = arith.addf %113, %136 : vector<16x32xf32>
    %138 = arith.addf %0, %137 : vector<16x32xf32>
    %c0_47 = arith.constant 0 : index
    %c0_48 = arith.constant 0 : index
    %c0_49 = arith.constant 0 : index
    %139 = vector.load %arg7[%c0_47, %c0_48, %c0_49] : memref<2x1x32xf32, #tpu.memory_space<vmem>>, vector<1x1x32xf32>
    %140 = vector.shape_cast %139 : vector<1x1x32xf32> to vector<1x32xf32>
    %141 = vector.broadcast %140 : vector<1x32xf32> to vector<16x32xf32>
    %142 = arith.addf %138, %141 : vector<16x32xf32>
    %c0_50 = arith.constant 0 : index
    %c0_51 = arith.constant 0 : index
    %c0_52 = arith.constant 0 : index
    %143 = vector.load %arg8[%c0_50, %c0_51, %c0_52] : memref<2x1x32xf32, #tpu.memory_space<vmem>>, vector<1x1x32xf32>
    %144 = vector.shape_cast %143 : vector<1x1x32xf32> to vector<1x32xf32>
    %c0_53 = arith.constant 0 : index
    %c0_54 = arith.constant 0 : index
    %c0_55 = arith.constant 0 : index
    %145 = vector.load %arg9[%c0_53, %c0_54, %c0_55] : memref<2x1x32xf32, #tpu.memory_space<vmem>>, vector<1x1x32xf32>
    %146 = vector.shape_cast %145 : vector<1x1x32xf32> to vector<1x32xf32>
    %cst_56 = arith.constant dense<0.000000e+00> : vector<16xf32>
    %147 = vector.multi_reduction <add>, %142, %cst_56 [1] : vector<16x32xf32> to vector<16xf32>
    %148 = vector.shape_cast %147 : vector<16xf32> to vector<16x1xf32>
    %cst_57 = arith.constant 3.200000e+01 : f32
    %149 = vector.broadcast %cst_57 : f32 to vector<16x1xf32>
    %150 = arith.divf %148, %149 : vector<16x1xf32>
    %151 = vector.broadcast %150 : vector<16x1xf32> to vector<16x32xf32>
    %152 = arith.subf %142, %151 : vector<16x32xf32>
    %153 = arith.mulf %152, %152 : vector<16x32xf32>
    %cst_58 = arith.constant dense<0.000000e+00> : vector<16xf32>
    %154 = vector.multi_reduction <add>, %153, %cst_58 [1] : vector<16x32xf32> to vector<16xf32>
    %155 = vector.shape_cast %154 : vector<16xf32> to vector<16x1xf32>
    %cst_59 = arith.constant 3.200000e+01 : f32
    %156 = vector.broadcast %cst_59 : f32 to vector<16x1xf32>
    %157 = arith.divf %155, %156 : vector<16x1xf32>
    %158 = vector.broadcast %150 : vector<16x1xf32> to vector<16x32xf32>
    %159 = arith.subf %142, %158 : vector<16x32xf32>
    %cst_60 = arith.constant 9.99999974E-6 : f32
    %160 = vector.broadcast %cst_60 : f32 to vector<16x1xf32>
    %161 = arith.addf %157, %160 : vector<16x1xf32>
    %162 = math.rsqrt %161 : vector<16x1xf32>
    %163 = vector.broadcast %162 : vector<16x1xf32> to vector<16x32xf32>
    %164 = arith.mulf %159, %163 : vector<16x32xf32>
    %165 = vector.broadcast %144 : vector<1x32xf32> to vector<16x32xf32>
    %166 = arith.mulf %164, %165 : vector<16x32xf32>
    %167 = vector.broadcast %146 : vector<1x32xf32> to vector<16x32xf32>
    %168 = arith.addf %166, %167 : vector<16x32xf32>
    %c0_61 = arith.constant 0 : index
    %c0_62 = arith.constant 0 : index
    %c0_63 = arith.constant 0 : index
    %169 = vector.load %arg10[%c0_61, %c0_62, %c0_63] : memref<2x32x64xf32, #tpu.memory_space<vmem>>, vector<1x32x64xf32>
    %170 = vector.shape_cast %169 : vector<1x32x64xf32> to vector<32x64xf32>
    %cst_64 = arith.constant dense<0.000000e+00> : vector<16x64xf32>
    %171 = tpu.matmul %168, %170, %cst_64 {dimension_numbers = #tpu.dot_dimension_numbers<[1], [0], [0], [1], [0, 0, 1, 1], [], []>} : vector<16x32xf32>, vector<32x64xf32>, vector<16x64xf32> -> vector<16x64xf32>
    %c0_65 = arith.constant 0 : index
    %c0_66 = arith.constant 0 : index
    %c0_67 = arith.constant 0 : index
    %172 = vector.load %arg11[%c0_65, %c0_66, %c0_67] : memref<2x1x64xf32, #tpu.memory_space<vmem>>, vector<1x1x64xf32>
    %173 = vector.shape_cast %172 : vector<1x1x64xf32> to vector<1x64xf32>
    %174 = vector.broadcast %173 : vector<1x64xf32> to vector<16x64xf32>
    %175 = arith.addf %171, %174 : vector<16x64xf32>
    %cst_68 = arith.constant 0.000000e+00 : f32
    %176 = vector.broadcast %cst_68 : f32 to vector<16x64xf32>
    %177 = arith.maximumf %175, %176 : vector<16x64xf32>
    %c0_69 = arith.constant 0 : index
    %c0_70 = arith.constant 0 : index
    %c0_71 = arith.constant 0 : index
    %178 = vector.load %arg12[%c0_69, %c0_70, %c0_71] : memref<2x64x32xf32, #tpu.memory_space<vmem>>, vector<1x64x32xf32>
    %179 = vector.shape_cast %178 : vector<1x64x32xf32> to vector<64x32xf32>
    %cst_72 = arith.constant dense<0.000000e+00> : vector<16x32xf32>
    %180 = tpu.matmul %177, %179, %cst_72 {dimension_numbers = #tpu.dot_dimension_numbers<[1], [0], [0], [1], [0, 0, 1, 1], [], []>} : vector<16x64xf32>, vector<64x32xf32>, vector<16x32xf32> -> vector<16x32xf32>
    %c0_73 = arith.constant 0 : index
    %c0_74 = arith.constant 0 : index
    %c0_75 = arith.constant 0 : index
    %181 = vector.load %arg13[%c0_73, %c0_74, %c0_75] : memref<2x1x32xf32, #tpu.memory_space<vmem>>, vector<1x1x32xf32>
    %182 = vector.shape_cast %181 : vector<1x1x32xf32> to vector<1x32xf32>
    %183 = vector.broadcast %182 : vector<1x32xf32> to vector<16x32xf32>
    %184 = arith.addf %180, %183 : vector<16x32xf32>
    %185 = arith.addf %142, %184 : vector<16x32xf32>
    %c1 = arith.constant 1 : index
    %c0_76 = arith.constant 0 : index
    %c0_77 = arith.constant 0 : index
    %186 = vector.load %arg2[%c1, %c0_76, %c0_77] : memref<2x1x32xf32, #tpu.memory_space<vmem>>, vector<1x1x32xf32>
    %187 = vector.shape_cast %186 : vector<1x1x32xf32> to vector<1x32xf32>
    %c1_78 = arith.constant 1 : index
    %c0_79 = arith.constant 0 : index
    %c0_80 = arith.constant 0 : index
    %188 = vector.load %arg3[%c1_78, %c0_79, %c0_80] : memref<2x1x32xf32, #tpu.memory_space<vmem>>, vector<1x1x32xf32>
    %189 = vector.shape_cast %188 : vector<1x1x32xf32> to vector<1x32xf32>
    %cst_81 = arith.constant dense<0.000000e+00> : vector<16xf32>
    %190 = vector.multi_reduction <add>, %185, %cst_81 [1] : vector<16x32xf32> to vector<16xf32>
    %191 = vector.shape_cast %190 : vector<16xf32> to vector<16x1xf32>
    %cst_82 = arith.constant 3.200000e+01 : f32
    %192 = vector.broadcast %cst_82 : f32 to vector<16x1xf32>
    %193 = arith.divf %191, %192 : vector<16x1xf32>
    %194 = vector.broadcast %193 : vector<16x1xf32> to vector<16x32xf32>
    %195 = arith.subf %185, %194 : vector<16x32xf32>
    %196 = arith.mulf %195, %195 : vector<16x32xf32>
    %cst_83 = arith.constant dense<0.000000e+00> : vector<16xf32>
    %197 = vector.multi_reduction <add>, %196, %cst_83 [1] : vector<16x32xf32> to vector<16xf32>
    %198 = vector.shape_cast %197 : vector<16xf32> to vector<16x1xf32>
    %cst_84 = arith.constant 3.200000e+01 : f32
    %199 = vector.broadcast %cst_84 : f32 to vector<16x1xf32>
    %200 = arith.divf %198, %199 : vector<16x1xf32>
    %201 = vector.broadcast %193 : vector<16x1xf32> to vector<16x32xf32>
    %202 = arith.subf %185, %201 : vector<16x32xf32>
    %cst_85 = arith.constant 9.99999974E-6 : f32
    %203 = vector.broadcast %cst_85 : f32 to vector<16x1xf32>
    %204 = arith.addf %200, %203 : vector<16x1xf32>
    %205 = math.rsqrt %204 : vector<16x1xf32>
    %206 = vector.broadcast %205 : vector<16x1xf32> to vector<16x32xf32>
    %207 = arith.mulf %202, %206 : vector<16x32xf32>
    %208 = vector.broadcast %187 : vector<1x32xf32> to vector<16x32xf32>
    %209 = arith.mulf %207, %208 : vector<16x32xf32>
    %210 = vector.broadcast %189 : vector<1x32xf32> to vector<16x32xf32>
    %211 = arith.addf %209, %210 : vector<16x32xf32>
    %c1_86 = arith.constant 1 : index
    %c0_87 = arith.constant 0 : index
    %c0_88 = arith.constant 0 : index
    %212 = vector.load %arg4[%c1_86, %c0_87, %c0_88] : memref<2x32x96xf32, #tpu.memory_space<vmem>>, vector<1x32x96xf32>
    %213 = vector.shape_cast %212 : vector<1x32x96xf32> to vector<32x96xf32>
    %cst_89 = arith.constant dense<0.000000e+00> : vector<16x96xf32>
    %214 = tpu.matmul %211, %213, %cst_89 {dimension_numbers = #tpu.dot_dimension_numbers<[1], [0], [0], [1], [0, 0, 1, 1], [], []>} : vector<16x32xf32>, vector<32x96xf32>, vector<16x96xf32> -> vector<16x96xf32>
    %c1_90 = arith.constant 1 : index
    %c0_91 = arith.constant 0 : index
    %c0_92 = arith.constant 0 : index
    %215 = vector.load %arg5[%c1_90, %c0_91, %c0_92] : memref<2x1x96xf32, #tpu.memory_space<vmem>>, vector<1x1x96xf32>
    %216 = vector.shape_cast %215 : vector<1x1x96xf32> to vector<1x96xf32>
    %217 = vector.broadcast %216 : vector<1x96xf32> to vector<16x96xf32>
    %218 = arith.addf %214, %217 : vector<16x96xf32>
    %c1_93 = arith.constant 1 : index
    %c0_94 = arith.constant 0 : index
    %c0_95 = arith.constant 0 : index
    %219 = vector.load %arg6[%c1_93, %c0_94, %c0_95] : memref<2x32x32xf32, #tpu.memory_space<vmem>>, vector<1x32x32xf32>
    %220 = vector.shape_cast %219 : vector<1x32x32xf32> to vector<32x32xf32>
    %cst_96 = arith.constant 0.000000e+00 : f32
    %221 = vector.broadcast %cst_96 : f32 to vector<16x32xf32>
    %222 = vector.extract_strided_slice %218 {offsets = [0, 0], sizes = [16, 8], strides = [1, 1]} : vector<16x96xf32> to vector<16x8xf32>
    %223 = vector.shape_cast %222 : vector<16x8xf32> to vector<2x8x8xf32>
    %224 = vector.extract_strided_slice %218 {offsets = [0, 32], sizes = [16, 8], strides = [1, 1]} : vector<16x96xf32> to vector<16x8xf32>
    %225 = vector.shape_cast %224 : vector<16x8xf32> to vector<2x8x8xf32>
    %226 = vector.extract_strided_slice %218 {offsets = [0, 64], sizes = [16, 8], strides = [1, 1]} : vector<16x96xf32> to vector<16x8xf32>
    %227 = vector.shape_cast %226 : vector<16x8xf32> to vector<2x8x8xf32>
    %cst_97 = arith.constant dense<0.000000e+00> : vector<2x8x8xf32>
    %228 = tpu.matmul %223, %225, %cst_97 {dimension_numbers = #tpu.dot_dimension_numbers<[2], [2], [1], [1], [0, 0, 0, 1, 1, 1], [0], [0]>} : vector<2x8x8xf32>, vector<2x8x8xf32>, vector<2x8x8xf32> -> vector<2x8x8xf32>
    %229 = vector.broadcast %5 : vector<2x1x8xf32> to vector<2x8x8xf32>
    %230 = arith.addf %228, %229 : vector<2x8x8xf32>
    %cst_98 = arith.constant dense<0xFF800000> : vector<2x8xf32>
    %231 = vector.multi_reduction <maximumf>, %230, %cst_98 [2] : vector<2x8x8xf32> to vector<2x8xf32>
    %232 = vector.shape_cast %231 : vector<2x8xf32> to vector<2x8x1xf32>
    %233 = vector.broadcast %232 : vector<2x8x1xf32> to vector<2x8x8xf32>
    %234 = arith.subf %230, %233 : vector<2x8x8xf32>
    %235 = math.exp %234 : vector<2x8x8xf32>
    %cst_99 = arith.constant dense<0.000000e+00> : vector<2x8xf32>
    %236 = vector.multi_reduction <add>, %235, %cst_99 [2] : vector<2x8x8xf32> to vector<2x8xf32>
    %237 = vector.shape_cast %236 : vector<2x8xf32> to vector<2x8x1xf32>
    %238 = tpu.reciprocal %237 {approx = true} : vector<2x8x1xf32> -> vector<2x8x1xf32>
    %239 = vector.broadcast %238 : vector<2x8x1xf32> to vector<2x8x8xf32>
    %240 = arith.mulf %235, %239 : vector<2x8x8xf32>
    %cst_100 = arith.constant dense<0.000000e+00> : vector<2x8x8xf32>
    %241 = tpu.matmul %240, %227, %cst_100 {dimension_numbers = #tpu.dot_dimension_numbers<[2], [1], [1], [2], [0, 0, 0, 1, 1, 2], [0], [0]>} : vector<2x8x8xf32>, vector<2x8x8xf32>, vector<2x8x8xf32> -> vector<2x8x8xf32>
    %242 = vector.shape_cast %241 : vector<2x8x8xf32> to vector<16x8xf32>
    %243 = vector.extract_strided_slice %220 {offsets = [0, 0], sizes = [8, 32], strides = [1, 1]} : vector<32x32xf32> to vector<8x32xf32>
    %cst_101 = arith.constant dense<0.000000e+00> : vector<16x32xf32>
    %244 = tpu.matmul %242, %243, %cst_101 {dimension_numbers = #tpu.dot_dimension_numbers<[1], [0], [0], [1], [0, 0, 1, 1], [], []>} : vector<16x8xf32>, vector<8x32xf32>, vector<16x32xf32> -> vector<16x32xf32>
    %245 = arith.addf %221, %244 : vector<16x32xf32>
    %246 = vector.extract_strided_slice %218 {offsets = [0, 8], sizes = [16, 8], strides = [1, 1]} : vector<16x96xf32> to vector<16x8xf32>
    %247 = vector.shape_cast %246 : vector<16x8xf32> to vector<2x8x8xf32>
    %248 = vector.extract_strided_slice %218 {offsets = [0, 40], sizes = [16, 8], strides = [1, 1]} : vector<16x96xf32> to vector<16x8xf32>
    %249 = vector.shape_cast %248 : vector<16x8xf32> to vector<2x8x8xf32>
    %250 = vector.extract_strided_slice %218 {offsets = [0, 72], sizes = [16, 8], strides = [1, 1]} : vector<16x96xf32> to vector<16x8xf32>
    %251 = vector.shape_cast %250 : vector<16x8xf32> to vector<2x8x8xf32>
    %cst_102 = arith.constant dense<0.000000e+00> : vector<2x8x8xf32>
    %252 = tpu.matmul %247, %249, %cst_102 {dimension_numbers = #tpu.dot_dimension_numbers<[2], [2], [1], [1], [0, 0, 0, 1, 1, 1], [0], [0]>} : vector<2x8x8xf32>, vector<2x8x8xf32>, vector<2x8x8xf32> -> vector<2x8x8xf32>
    %253 = vector.broadcast %5 : vector<2x1x8xf32> to vector<2x8x8xf32>
    %254 = arith.addf %252, %253 : vector<2x8x8xf32>
    %cst_103 = arith.constant dense<0xFF800000> : vector<2x8xf32>
    %255 = vector.multi_reduction <maximumf>, %254, %cst_103 [2] : vector<2x8x8xf32> to vector<2x8xf32>
    %256 = vector.shape_cast %255 : vector<2x8xf32> to vector<2x8x1xf32>
    %257 = vector.broadcast %256 : vector<2x8x1xf32> to vector<2x8x8xf32>
    %258 = arith.subf %254, %257 : vector<2x8x8xf32>
    %259 = math.exp %258 : vector<2x8x8xf32>
    %cst_104 = arith.constant dense<0.000000e+00> : vector<2x8xf32>
    %260 = vector.multi_reduction <add>, %259, %cst_104 [2] : vector<2x8x8xf32> to vector<2x8xf32>
    %261 = vector.shape_cast %260 : vector<2x8xf32> to vector<2x8x1xf32>
    %262 = tpu.reciprocal %261 {approx = true} : vector<2x8x1xf32> -> vector<2x8x1xf32>
    %263 = vector.broadcast %262 : vector<2x8x1xf32> to vector<2x8x8xf32>
    %264 = arith.mulf %259, %263 : vector<2x8x8xf32>
    %cst_105 = arith.constant dense<0.000000e+00> : vector<2x8x8xf32>
    %265 = tpu.matmul %264, %251, %cst_105 {dimension_numbers = #tpu.dot_dimension_numbers<[2], [1], [1], [2], [0, 0, 0, 1, 1, 2], [0], [0]>} : vector<2x8x8xf32>, vector<2x8x8xf32>, vector<2x8x8xf32> -> vector<2x8x8xf32>
    %266 = vector.shape_cast %265 : vector<2x8x8xf32> to vector<16x8xf32>
    %267 = vector.extract_strided_slice %220 {offsets = [8, 0], sizes = [8, 32], strides = [1, 1]} : vector<32x32xf32> to vector<8x32xf32>
    %cst_106 = arith.constant dense<0.000000e+00> : vector<16x32xf32>
    %268 = tpu.matmul %266, %267, %cst_106 {dimension_numbers = #tpu.dot_dimension_numbers<[1], [0], [0], [1], [0, 0, 1, 1], [], []>} : vector<16x8xf32>, vector<8x32xf32>, vector<16x32xf32> -> vector<16x32xf32>
    %269 = arith.addf %245, %268 : vector<16x32xf32>
    %270 = vector.extract_strided_slice %218 {offsets = [0, 16], sizes = [16, 8], strides = [1, 1]} : vector<16x96xf32> to vector<16x8xf32>
    %271 = vector.shape_cast %270 : vector<16x8xf32> to vector<2x8x8xf32>
    %272 = vector.extract_strided_slice %218 {offsets = [0, 48], sizes = [16, 8], strides = [1, 1]} : vector<16x96xf32> to vector<16x8xf32>
    %273 = vector.shape_cast %272 : vector<16x8xf32> to vector<2x8x8xf32>
    %274 = vector.extract_strided_slice %218 {offsets = [0, 80], sizes = [16, 8], strides = [1, 1]} : vector<16x96xf32> to vector<16x8xf32>
    %275 = vector.shape_cast %274 : vector<16x8xf32> to vector<2x8x8xf32>
    %cst_107 = arith.constant dense<0.000000e+00> : vector<2x8x8xf32>
    %276 = tpu.matmul %271, %273, %cst_107 {dimension_numbers = #tpu.dot_dimension_numbers<[2], [2], [1], [1], [0, 0, 0, 1, 1, 1], [0], [0]>} : vector<2x8x8xf32>, vector<2x8x8xf32>, vector<2x8x8xf32> -> vector<2x8x8xf32>
    %277 = vector.broadcast %5 : vector<2x1x8xf32> to vector<2x8x8xf32>
    %278 = arith.addf %276, %277 : vector<2x8x8xf32>
    %cst_108 = arith.constant dense<0xFF800000> : vector<2x8xf32>
    %279 = vector.multi_reduction <maximumf>, %278, %cst_108 [2] : vector<2x8x8xf32> to vector<2x8xf32>
    %280 = vector.shape_cast %279 : vector<2x8xf32> to vector<2x8x1xf32>
    %281 = vector.broadcast %280 : vector<2x8x1xf32> to vector<2x8x8xf32>
    %282 = arith.subf %278, %281 : vector<2x8x8xf32>
    %283 = math.exp %282 : vector<2x8x8xf32>
    %cst_109 = arith.constant dense<0.000000e+00> : vector<2x8xf32>
    %284 = vector.multi_reduction <add>, %283, %cst_109 [2] : vector<2x8x8xf32> to vector<2x8xf32>
    %285 = vector.shape_cast %284 : vector<2x8xf32> to vector<2x8x1xf32>
    %286 = tpu.reciprocal %285 {approx = true} : vector<2x8x1xf32> -> vector<2x8x1xf32>
    %287 = vector.broadcast %286 : vector<2x8x1xf32> to vector<2x8x8xf32>
    %288 = arith.mulf %283, %287 : vector<2x8x8xf32>
    %cst_110 = arith.constant dense<0.000000e+00> : vector<2x8x8xf32>
    %289 = tpu.matmul %288, %275, %cst_110 {dimension_numbers = #tpu.dot_dimension_numbers<[2], [1], [1], [2], [0, 0, 0, 1, 1, 2], [0], [0]>} : vector<2x8x8xf32>, vector<2x8x8xf32>, vector<2x8x8xf32> -> vector<2x8x8xf32>
    %290 = vector.shape_cast %289 : vector<2x8x8xf32> to vector<16x8xf32>
    %291 = vector.extract_strided_slice %220 {offsets = [16, 0], sizes = [8, 32], strides = [1, 1]} : vector<32x32xf32> to vector<8x32xf32>
    %cst_111 = arith.constant dense<0.000000e+00> : vector<16x32xf32>
    %292 = tpu.matmul %290, %291, %cst_111 {dimension_numbers = #tpu.dot_dimension_numbers<[1], [0], [0], [1], [0, 0, 1, 1], [], []>} : vector<16x8xf32>, vector<8x32xf32>, vector<16x32xf32> -> vector<16x32xf32>
    %293 = arith.addf %269, %292 : vector<16x32xf32>
    %294 = vector.extract_strided_slice %218 {offsets = [0, 24], sizes = [16, 8], strides = [1, 1]} : vector<16x96xf32> to vector<16x8xf32>
    %295 = vector.shape_cast %294 : vector<16x8xf32> to vector<2x8x8xf32>
    %296 = vector.extract_strided_slice %218 {offsets = [0, 56], sizes = [16, 8], strides = [1, 1]} : vector<16x96xf32> to vector<16x8xf32>
    %297 = vector.shape_cast %296 : vector<16x8xf32> to vector<2x8x8xf32>
    %298 = vector.extract_strided_slice %218 {offsets = [0, 88], sizes = [16, 8], strides = [1, 1]} : vector<16x96xf32> to vector<16x8xf32>
    %299 = vector.shape_cast %298 : vector<16x8xf32> to vector<2x8x8xf32>
    %cst_112 = arith.constant dense<0.000000e+00> : vector<2x8x8xf32>
    %300 = tpu.matmul %295, %297, %cst_112 {dimension_numbers = #tpu.dot_dimension_numbers<[2], [2], [1], [1], [0, 0, 0, 1, 1, 1], [0], [0]>} : vector<2x8x8xf32>, vector<2x8x8xf32>, vector<2x8x8xf32> -> vector<2x8x8xf32>
    %301 = vector.broadcast %5 : vector<2x1x8xf32> to vector<2x8x8xf32>
    %302 = arith.addf %300, %301 : vector<2x8x8xf32>
    %cst_113 = arith.constant dense<0xFF800000> : vector<2x8xf32>
    %303 = vector.multi_reduction <maximumf>, %302, %cst_113 [2] : vector<2x8x8xf32> to vector<2x8xf32>
    %304 = vector.shape_cast %303 : vector<2x8xf32> to vector<2x8x1xf32>
    %305 = vector.broadcast %304 : vector<2x8x1xf32> to vector<2x8x8xf32>
    %306 = arith.subf %302, %305 : vector<2x8x8xf32>
    %307 = math.exp %306 : vector<2x8x8xf32>
    %cst_114 = arith.constant dense<0.000000e+00> : vector<2x8xf32>
    %308 = vector.multi_reduction <add>, %307, %cst_114 [2] : vector<2x8x8xf32> to vector<2x8xf32>
    %309 = vector.shape_cast %308 : vector<2x8xf32> to vector<2x8x1xf32>
    %310 = tpu.reciprocal %309 {approx = true} : vector<2x8x1xf32> -> vector<2x8x1xf32>
    %311 = vector.broadcast %310 : vector<2x8x1xf32> to vector<2x8x8xf32>
    %312 = arith.mulf %307, %311 : vector<2x8x8xf32>
    %cst_115 = arith.constant dense<0.000000e+00> : vector<2x8x8xf32>
    %313 = tpu.matmul %312, %299, %cst_115 {dimension_numbers = #tpu.dot_dimension_numbers<[2], [1], [1], [2], [0, 0, 0, 1, 1, 2], [0], [0]>} : vector<2x8x8xf32>, vector<2x8x8xf32>, vector<2x8x8xf32> -> vector<2x8x8xf32>
    %314 = vector.shape_cast %313 : vector<2x8x8xf32> to vector<16x8xf32>
    %315 = vector.extract_strided_slice %220 {offsets = [24, 0], sizes = [8, 32], strides = [1, 1]} : vector<32x32xf32> to vector<8x32xf32>
    %cst_116 = arith.constant dense<0.000000e+00> : vector<16x32xf32>
    %316 = tpu.matmul %314, %315, %cst_116 {dimension_numbers = #tpu.dot_dimension_numbers<[1], [0], [0], [1], [0, 0, 1, 1], [], []>} : vector<16x8xf32>, vector<8x32xf32>, vector<16x32xf32> -> vector<16x32xf32>
    %317 = arith.addf %293, %316 : vector<16x32xf32>
    %318 = arith.addf %185, %317 : vector<16x32xf32>
    %c1_117 = arith.constant 1 : index
    %c0_118 = arith.constant 0 : index
    %c0_119 = arith.constant 0 : index
    %319 = vector.load %arg7[%c1_117, %c0_118, %c0_119] : memref<2x1x32xf32, #tpu.memory_space<vmem>>, vector<1x1x32xf32>
    %320 = vector.shape_cast %319 : vector<1x1x32xf32> to vector<1x32xf32>
    %321 = vector.broadcast %320 : vector<1x32xf32> to vector<16x32xf32>
    %322 = arith.addf %318, %321 : vector<16x32xf32>
    %c1_120 = arith.constant 1 : index
    %c0_121 = arith.constant 0 : index
    %c0_122 = arith.constant 0 : index
    %323 = vector.load %arg8[%c1_120, %c0_121, %c0_122] : memref<2x1x32xf32, #tpu.memory_space<vmem>>, vector<1x1x32xf32>
    %324 = vector.shape_cast %323 : vector<1x1x32xf32> to vector<1x32xf32>
    %c1_123 = arith.constant 1 : index
    %c0_124 = arith.constant 0 : index
    %c0_125 = arith.constant 0 : index
    %325 = vector.load %arg9[%c1_123, %c0_124, %c0_125] : memref<2x1x32xf32, #tpu.memory_space<vmem>>, vector<1x1x32xf32>
    %326 = vector.shape_cast %325 : vector<1x1x32xf32> to vector<1x32xf32>
    %cst_126 = arith.constant dense<0.000000e+00> : vector<16xf32>
    %327 = vector.multi_reduction <add>, %322, %cst_126 [1] : vector<16x32xf32> to vector<16xf32>
    %328 = vector.shape_cast %327 : vector<16xf32> to vector<16x1xf32>
    %cst_127 = arith.constant 3.200000e+01 : f32
    %329 = vector.broadcast %cst_127 : f32 to vector<16x1xf32>
    %330 = arith.divf %328, %329 : vector<16x1xf32>
    %331 = vector.broadcast %330 : vector<16x1xf32> to vector<16x32xf32>
    %332 = arith.subf %322, %331 : vector<16x32xf32>
    %333 = arith.mulf %332, %332 : vector<16x32xf32>
    %cst_128 = arith.constant dense<0.000000e+00> : vector<16xf32>
    %334 = vector.multi_reduction <add>, %333, %cst_128 [1] : vector<16x32xf32> to vector<16xf32>
    %335 = vector.shape_cast %334 : vector<16xf32> to vector<16x1xf32>
    %cst_129 = arith.constant 3.200000e+01 : f32
    %336 = vector.broadcast %cst_129 : f32 to vector<16x1xf32>
    %337 = arith.divf %335, %336 : vector<16x1xf32>
    %338 = vector.broadcast %330 : vector<16x1xf32> to vector<16x32xf32>
    %339 = arith.subf %322, %338 : vector<16x32xf32>
    %cst_130 = arith.constant 9.99999974E-6 : f32
    %340 = vector.broadcast %cst_130 : f32 to vector<16x1xf32>
    %341 = arith.addf %337, %340 : vector<16x1xf32>
    %342 = math.rsqrt %341 : vector<16x1xf32>
    %343 = vector.broadcast %342 : vector<16x1xf32> to vector<16x32xf32>
    %344 = arith.mulf %339, %343 : vector<16x32xf32>
    %345 = vector.broadcast %324 : vector<1x32xf32> to vector<16x32xf32>
    %346 = arith.mulf %344, %345 : vector<16x32xf32>
    %347 = vector.broadcast %326 : vector<1x32xf32> to vector<16x32xf32>
    %348 = arith.addf %346, %347 : vector<16x32xf32>
    %c1_131 = arith.constant 1 : index
    %c0_132 = arith.constant 0 : index
    %c0_133 = arith.constant 0 : index
    %349 = vector.load %arg10[%c1_131, %c0_132, %c0_133] : memref<2x32x64xf32, #tpu.memory_space<vmem>>, vector<1x32x64xf32>
    %350 = vector.shape_cast %349 : vector<1x32x64xf32> to vector<32x64xf32>
    %cst_134 = arith.constant dense<0.000000e+00> : vector<16x64xf32>
    %351 = tpu.matmul %348, %350, %cst_134 {dimension_numbers = #tpu.dot_dimension_numbers<[1], [0], [0], [1], [0, 0, 1, 1], [], []>} : vector<16x32xf32>, vector<32x64xf32>, vector<16x64xf32> -> vector<16x64xf32>
    %c1_135 = arith.constant 1 : index
    %c0_136 = arith.constant 0 : index
    %c0_137 = arith.constant 0 : index
    %352 = vector.load %arg11[%c1_135, %c0_136, %c0_137] : memref<2x1x64xf32, #tpu.memory_space<vmem>>, vector<1x1x64xf32>
    %353 = vector.shape_cast %352 : vector<1x1x64xf32> to vector<1x64xf32>
    %354 = vector.broadcast %353 : vector<1x64xf32> to vector<16x64xf32>
    %355 = arith.addf %351, %354 : vector<16x64xf32>
    %cst_138 = arith.constant 0.000000e+00 : f32
    %356 = vector.broadcast %cst_138 : f32 to vector<16x64xf32>
    %357 = arith.maximumf %355, %356 : vector<16x64xf32>
    %c1_139 = arith.constant 1 : index
    %c0_140 = arith.constant 0 : index
    %c0_141 = arith.constant 0 : index
    %358 = vector.load %arg12[%c1_139, %c0_140, %c0_141] : memref<2x64x32xf32, #tpu.memory_space<vmem>>, vector<1x64x32xf32>
    %359 = vector.shape_cast %358 : vector<1x64x32xf32> to vector<64x32xf32>
    %cst_142 = arith.constant dense<0.000000e+00> : vector<16x32xf32>
    %360 = tpu.matmul %357, %359, %cst_142 {dimension_numbers = #tpu.dot_dimension_numbers<[1], [0], [0], [1], [0, 0, 1, 1], [], []>} : vector<16x64xf32>, vector<64x32xf32>, vector<16x32xf32> -> vector<16x32xf32>
    %c1_143 = arith.constant 1 : index
    %c0_144 = arith.constant 0 : index
    %c0_145 = arith.constant 0 : index
    %361 = vector.load %arg13[%c1_143, %c0_144, %c0_145] : memref<2x1x32xf32, #tpu.memory_space<vmem>>, vector<1x1x32xf32>
    %362 = vector.shape_cast %361 : vector<1x1x32xf32> to vector<1x32xf32>
    %363 = vector.broadcast %362 : vector<1x32xf32> to vector<16x32xf32>
    %364 = arith.addf %360, %363 : vector<16x32xf32>
    %365 = arith.addf %322, %364 : vector<16x32xf32>
    %c0_146 = arith.constant 0 : index
    %c0_147 = arith.constant 0 : index
    %366 = vector.load %arg14[%c0_146, %c0_147] : memref<1x32xf32, #tpu.memory_space<vmem>>, vector<1x32xf32>
    %c0_148 = arith.constant 0 : index
    %c0_149 = arith.constant 0 : index
    %367 = vector.load %arg15[%c0_148, %c0_149] : memref<1x32xf32, #tpu.memory_space<vmem>>, vector<1x32xf32>
    %cst_150 = arith.constant dense<0.000000e+00> : vector<16xf32>
    %368 = vector.multi_reduction <add>, %365, %cst_150 [1] : vector<16x32xf32> to vector<16xf32>
    %369 = vector.shape_cast %368 : vector<16xf32> to vector<16x1xf32>
    %cst_151 = arith.constant 3.200000e+01 : f32
    %370 = vector.broadcast %cst_151 : f32 to vector<16x1xf32>
    %371 = arith.divf %369, %370 : vector<16x1xf32>
    %372 = vector.broadcast %371 : vector<16x1xf32> to vector<16x32xf32>
    %373 = arith.subf %365, %372 : vector<16x32xf32>
    %374 = arith.mulf %373, %373 : vector<16x32xf32>
    %cst_152 = arith.constant dense<0.000000e+00> : vector<16xf32>
    %375 = vector.multi_reduction <add>, %374, %cst_152 [1] : vector<16x32xf32> to vector<16xf32>
    %376 = vector.shape_cast %375 : vector<16xf32> to vector<16x1xf32>
    %cst_153 = arith.constant 3.200000e+01 : f32
    %377 = vector.broadcast %cst_153 : f32 to vector<16x1xf32>
    %378 = arith.divf %376, %377 : vector<16x1xf32>
    %379 = vector.broadcast %371 : vector<16x1xf32> to vector<16x32xf32>
    %380 = arith.subf %365, %379 : vector<16x32xf32>
    %cst_154 = arith.constant 9.99999974E-6 : f32
    %381 = vector.broadcast %cst_154 : f32 to vector<16x1xf32>
    %382 = arith.addf %378, %381 : vector<16x1xf32>
    %383 = math.rsqrt %382 : vector<16x1xf32>
    %384 = vector.broadcast %383 : vector<16x1xf32> to vector<16x32xf32>
    %385 = arith.mulf %380, %384 : vector<16x32xf32>
    %386 = vector.broadcast %366 : vector<1x32xf32> to vector<16x32xf32>
    %387 = arith.mulf %385, %386 : vector<16x32xf32>
    %388 = vector.broadcast %367 : vector<1x32xf32> to vector<16x32xf32>
    %389 = arith.addf %387, %388 : vector<16x32xf32>
    %c0_155 = arith.constant 0 : index
    %c0_156 = arith.constant 0 : index
    %390 = vector.load %arg16[%c0_155, %c0_156] : memref<16x32xf32, #tpu.memory_space<vmem>>, vector<16x32xf32>
    tpu.vector_store %arg16[%c0_155, %c0_156], %389 {strides = array<i32>} : memref<16x32xf32, #tpu.memory_space<vmem>>, vector<16x32xf32>,
    return
  }
}

</mosaic_0001>

<bundles_post_ra>
// kernel: summarizer_encode.1
= control target key start
LH: loop header
LB: loop body
LE: loop exit
PB: predicated region body
PF: predicated region fallthrough
CT: control target
= control target key end

     0   :  { %vm63_vm0 = vcmask 261120   ;;  %v2133_v4 = vmov 32.0   ;;  %s2134_s25 = smov 96   ;;  %s2135_s26 = smov 88   ;;  %vm175_vm8 = vcmask 64512   ;;  %vm926_vm12 = vcmask 523264   ;;  %s2746_s0 = inlined_call_operand.vmem [shape: f32[16,32], index: 0, kind: input, shape index: {}]   ;;  %s2747_s2 = inlined_call_operand.vmem [shape: f32[2,1,32], index: 2, kind: input, shape index: {}]   ;;  %s2748_s3 = inlined_call_operand.vmem [shape: f32[2,1,32], index: 3, kind: input, shape index: {}]   ;;  %s2749_s5 = inlined_call_operand.vmem [shape: f32[2,1,96], index: 5, kind: input, shape index: {}]   ;;  %s2750_s4 = inlined_call_operand.vmem [shape: f32[2,32,96], index: 4, kind: input, shape index: {}]   ;;  %s2751_s1 = inlined_call_operand.vmem [shape: f32[2,1,8], index: 1, kind: input, shape index: {}]   ;;  %s2752_s6 = inlined_call_operand.vmem [shape: f32[2,32,32], index: 6, kind: input, shape index: {}]   ;;  %s2753_s7 = inlined_call_operand.vmem [shape: f32[2,1,32], index: 7, kind: input, shape index: {}]   ;;  %s2754_s8 = inlined_call_operand.vmem [shape: f32[2,1,32], index: 8, kind: input, shape index: {}]   ;;  %s2755_s9 = inlined_call_operand.vmem [shape: f32[2,1,32], index: 9, kind: input, shape index: {}]   ;;  %s2756_s11 = inlined_call_operand.vmem [shape: f32[2,1,64], index: 11, kind: input, shape index: {}]   ;;  %s2757_s10 = inlined_call_operand.vmem [shape: f32[2,32,64], index: 10, kind: input, shape index: {}]   ;;  %s2758_s12 = inlined_call_operand.vmem [shape: f32[2,64,32], index: 12, kind: input, shape index: {}]   ;;  %s2759_s13 = inlined_call_operand.vmem [shape: f32[2,1,32], index: 13, kind: input, shape index: {}]   ;;  %s2760_s14 = inlined_call_operand.vmem [shape: f32[1,32], index: 14, kind: input, shape index: {}]   ;;  %s2761_s15 = inlined_call_operand.vmem [shape: f32[1,32], index: 15, kind: input, shape index: {}]   ;;  %s2762_s16 = inlined_call_operand.vmem [shape: f32[16,32], index: 16, kind: output, shape index: {}]  }
   0x1   :  { %2774 = sst [smem:[#allocation2_spill]] %s2746_s0  ;;  %2047 = vrcp.f32 %v2133_v4  ;;  %v128_v21 = vld [vmem:[%s2750_s4 + $0x18] sm:$0xff]  ;;  %v127_v22 = vld [vmem:[%s2750_s4 + $0x10] sm:$0xff]  ;;  %v126_v23 = vld [vmem:[%s2750_s4 + $0x8] sm:$0xff]  ;;  %s2136_s27 = smov 120  }
   0x2   :  { %s2775_s23 = sld [smem:[#allocation2_spill]]  ;;  %151 = vmatpush.msra.mxu0 %v128_v21  ;;  %v125_v24 = vld [vmem:[%s2750_s4] sm:$0xff]  ;;  %s2137_s30 = smov 64  }
   0x3   :  { %v2029_v43 = vld [vmem:[%s2747_s2] ss:$0 sm:$0xff]  ;;  %s2772_s18 = smov 112   ;;  %s2766_s21 = smov 104  }
   0x4   :  { %152 = vmatpush.msra.mxu0 %v127_v22  ;;  %v2030_v47 = vld [vmem:[%s2748_s3] ss:$0 sm:$0xff]  ;;  %s2768_s22 = smov 72   ;;  %s2764_s29 = smov 40  }
   0x5   :  { %v2033_v53 = vld [vmem:[%s2749_s5] ss:$0 sm:$0xff]  ;;  %s2770_s0 = smov 48   ;;  %s2779_s28 = smov 104  }
   0x6   :  { %153 = vmatpush.msra.mxu0 %v126_v23 }
   0x7   :  { %v2048_v5 = vpop.eup %2047 }
   0x8   :  { %v2233_v0 = vld [vmem:[%s2775_s23] sm:$0xff]  ;;  %v2238_v1 = vld [vmem:[%s2775_s23 + $0x8] sm:$0xff]  ;;  %v71_v6 = vmul.f32 32.0, %v2048_v5  ;;  %vm75_vm1 = vweird.f32 %v2048_v5  ;;  %154 = vmatpush.msra.mxu0 %v125_v24  ;;  %s2142_s23 = smov 80  }
   0x9   :  { %v64_v2 = vsel %vm63_vm0, %v2233_v0, 0.0  ;;  %v67_v3 = vsel %vm63_vm0, %v2238_v1, 0.0 }
   0xa   :  { %65 = vadd.xlane.f32.xlu0 %v64_v2  ;;  %68 = vadd.xlane.f32.xlu1 %v67_v3  ;;  %v72_v7 = vsub.f32 1.0, %v71_v6  ;;  %v55_v2 = vld [vmem:[%s2751_s1] sm:$0x1] }
   0xb   :  { %v57_v3 = vsub.f32 1.0, %v55_v2 }
   0xc   :  { %v73_v8 = vmul.f32 %v2048_v5, %v72_v7 }
   0xd   :  { %v59_v4 = vmul.f32 -1e+09, %v57_v3 }
   0xe   :  { %v74_v9 = vadd.f32 %v2048_v5, %v73_v8 }
  0x10   :  { %v2244_v10 = vsel %vm75_vm1, %v2048_v5, %v74_v9  ;;  %v2304_v5 = vperm.slane %v59_v4, 0 }
  0x7d   :  { %v66_v11 = vpop.xlane.xlu0 %65  ;;  %v69_v12 = vpop.xlane.xlu1 %68 }
  0x7e   :  { %v77_v13 = vmul.f32 %v2244_v10, %v66_v11  ;;  %v78_v14 = vmul.f32 %v2244_v10, %v69_v12 }
  0x80   :  { %v79_v15 = vsub.f32 %v2233_v0, %v77_v13  ;;  %v80_v16 = vsub.f32 %v2238_v1, %v78_v14 }
  0x82   :  { %v81_v17 = vmul.f32 %v79_v15, %v79_v15  ;;  %v82_v18 = vmul.f32 %v80_v16, %v80_v16 }
  0x84   :  { %v83_v19 = vsel %vm63_vm0, %v81_v17, 0.0  ;;  %v86_v20 = vsel %vm63_vm0, %v82_v18, 0.0 }
  0x85   :  { %84 = vadd.xlane.f32.xlu0 %v83_v19  ;;  %87 = vadd.xlane.f32.xlu2 %v86_v20 }
  0xf8   :  { %v85_v25 = vpop.xlane.xlu0 %84  ;;  %v88_v26 = vpop.xlane.xlu2 %87 }
  0xf9   :  { %v89_v27 = vmul.f32 %v85_v25, %v2244_v10  ;;  %v90_v28 = vmul.f32 %v88_v26, %v2244_v10 }
  0xfb   :  { %v91_v29 = vadd.f32 1e-05, %v89_v27  ;;  %v92_v30 = vadd.f32 1e-05, %v90_v28 }
  0xfd   :  { %2049 = vrsqrt.f32 %v91_v29  ;;  %vm109_vm2 = vweird.f32 %v92_v30  ;;  %vm99_vm5 = vweird.f32 %v91_v29 }
  0xfe   :  { %2051 = vrsqrt.f32 %v92_v30 }
 0x103   :  { %v2050_v31 = vpop.eup %2049 }
 0x104   :  { %v2052_v32 = vpop.eup %2051  ;;  %v94_v33 = vmul.f32 %v2050_v31, %v91_v29  ;;  %vm100_vm4 = vweird.f32 %v2050_v31 }
 0x105   :  { %v104_v34 = vmul.f32 %v2052_v32, %v92_v30  ;;  %vm110_vm3 = vweird.f32 %v2052_v32  ;;  %vm101_vm7 = vmor %vm99_vm5, %vm100_vm4 }
 0x106   :  { %v95_v35 = vmul.f32 %v2050_v31, %v94_v33  ;;  %vm111_vm6 = vmor %vm109_vm2, %vm110_vm3 }
 0x107   :  { %v105_v36 = vmul.f32 %v2052_v32, %v104_v34 }
 0x108   :  { %v96_v37 = vmul.f32 0.5, %v95_v35 }
 0x109   :  { %v106_v38 = vmul.f32 0.5, %v105_v36 }
 0x10a   :  { %v97_v39 = vsub.f32 1.5, %v96_v37 }
 0x10b   :  { %v107_v40 = vsub.f32 1.5, %v106_v38 }
 0x10c   :  { %v98_v41 = vmul.f32 %v2050_v31, %v97_v39 }
 0x10d   :  { %v108_v42 = vmul.f32 %v2052_v32, %v107_v40 }
 0x10e   :  { %v102_v44 = vsel %vm101_vm7, %v2050_v31, %v98_v41 }
 0x10f   :  { %v112_v45 = vsel %vm111_vm6, %v2052_v32, %v108_v42  ;;  %v113_v46 = vmul.f32 %v102_v44, %v79_v15  ;;  %v56_v15 = vld [vmem:[%s2751_s1 + $0x1] sm:$0x1]  ;;  %s2139_s1 = smov 56  }
 0x110   :  { %v114_v49 = vmul.f32 %v112_v45, %v80_v16  ;;  %v58_v16 = vsub.f32 1.0, %v56_v15  ;;  %v162_v32 = vld [vmem:[%s2752_s6] sm:$0xff] }
 0x111   :  { %v118_v48 = vmul.f32 %v2029_v43, %v113_v46  ;;  %481 = vmatpush.msrb.mxu0 %v162_v32 }
 0x112   :  { %v119_v51 = vmul.f32 %v2029_v43, %v114_v49  ;;  %v60_v17 = vmul.f32 -1e+09, %v58_v16 }
 0x113   :  { %v123_v50 = vadd.f32 %v2030_v47, %v118_v48 }
 0x114   :  { %v124_v52 = vadd.f32 %v2030_v47, %v119_v51  ;;  %v2314_v18 = vperm.slane %v60_v17, 0 }
 0x115   :  { %1913 = vmatmul.msk.f32.vlgmr.msra.gmra.mxu0 %vm63_vm0, %v123_v50 }
 0x11d   :  { %1914 = vmatmul.msk.f32.gmra.mxu0 %vm63_vm0, %v124_v52 }
 0x192   :  { %v156_v54 = vpop.f32.mrf.mxu0 }
 0x193   :  { %v2277_v55 = vadd.f32 %v2033_v53, %v156_v54 }
 0x195   :  { %173 = vrot.lane.b32.xlu1 %v2277_v55, %s2134_s25 }
 0x19a   :  { %v159_v56 = vpop.f32.mrf.mxu0 }
 0x19b   :  { %v2281_v57 = vadd.f32 %v2033_v53, %v159_v56 }
 0x19d   :  { %201 = vrot.lane.b32.xlu0 %v2281_v57, %s2134_s25  ;;  %303 = vrot.lane.b32.xlu1 %v2277_v55, %s2135_s26 }
 0x1a5   :  { %301 = vrot.lane.b32.xlu0 %v2277_v55, %s2136_s27  ;;  %331 = vrot.lane.b32.xlu1 %v2281_v57, %s2135_s26 }
 0x1ad   :  { %329 = vrot.lane.b32.xlu0 %v2281_v57, %s2136_s27 }
 0x207   :  { %v174_v58 = vpop.permute.xlu1 %173 }
 0x208   :  { %1915 = vmatpush.xpose.msk.msra.mxu1 %vm175_vm8, %v174_v58 }
 0x20b   :  { %1916 = vmatmul.msk.f32.vlgmr.msra.gmra.mxu1 %vm175_vm8, %v2277_v55 }
 0x20f   :  { %v202_v59 = vpop.permute.xlu0 %201  ;;  %v304_v60 = vpop.permute.xlu1 %303 }
 0x210   :  { %1917 = vmatpush.xpose.msk.msra.mxu2 %vm175_vm8, %v202_v59 }
 0x213   :  { %1918 = vmatmul.msk.f32.vlgmr.msra.gmra.mxu2 %vm175_vm8, %v2281_v57 }
 0x217   :  { %v302_v61 = vpop.permute.xlu0 %301  ;;  %v332_v62 = vpop.permute.xlu1 %331 }
 0x218   :  { %1923 = vmatpush.xpose.msk.msrb.mxu2 %vm175_vm8, %v332_v62 }
 0x21f   :  { %v330_v63 = vpop.permute.xlu0 %329 }
 0x220   :  { %1924 = vmatmul.msk.f32.vlgmr.msrb.gmra.mxu2 %vm175_vm8, %v330_v63 }
 0x288   :  { %v197_v6 = vpop.f32.mrf.mxu1 }
 0x289   :  { %v198_v7 = vadd.f32 %v197_v6, %v2304_v5 }
 0x28b   :  { %v227_v8 = vsel %vm175_vm8, %v198_v7, -inf }
 0x28c   :  { %228 = vmax.xlane.f32.xlu2 %v227_v8 }
 0x296   :  { %v224_v19 = vpop.f32.mrf.mxu2 }
 0x297   :  { %v225_v20 = vadd.f32 %v224_v19, %v2314_v18 }
 0x299   :  { %v230_v21 = vsel %vm175_vm8, %v225_v20, -inf }
 0x2a3   :  { %v354_v33 = vpop.f32.mrf.mxu2 }
 0x2a4   :  { %v355_v34 = vadd.f32 %v354_v33, %v2314_v18 }
 0x2a6   :  { %v360_v36 = vsel %vm175_vm8, %v355_v34, -inf }
 0x2ff   :  { %v229_v9 = vpop.xlane.xlu2 %228 }
 0x300   :  { %v233_v11 = vsub.f32 %v198_v7, %v229_v9  ;;  %v163_v9 = vld [vmem:[%s2752_s6 + $0x8] sm:$0xff] }
 0x301   :  { %452 = vmatpush.msra.mxu2 %v163_v9 }
 0x302   :  { %v235_v12 = vmul.f32 1.442695, %v233_v11 }
 0x304   :  { %2053 = vpow2.f32 %v235_v12 }
 0x30a   :  { %v2054_v13 = vpop.eup %2053 }
 0x30b   :  { %v239_v14 = vsel %vm175_vm8, %v2054_v13, 0.0 }
 0x30c   :  { %240 = vadd.xlane.f32.xlu2 %v239_v14 }
 0x324   :  { %249 = vrot.lane.b32.xlu2 %v2277_v55, %s2137_s30 }
 0x34d   :  { %231 = vmax.xlane.f32.xlu2 %v230_v21 }
 0x365   :  { %275 = vrot.lane.b32.xlu2 %v2281_v57, %s2137_s30 }
 0x36d   :  { %489 = vrot.lane.b32.xlu2 %v2277_v55, %s2772_s18 }
 0x37f   :  { %v241_v22 = vpop.xlane.xlu2 %240 }
 0x380   :  { %2055 = vrcp.f32 %v241_v22 }
 0x386   :  { %v2056_v23 = vpop.eup %2055 }
 0x387   :  { %v250_v24 = vpop.permute.xlu2 %249  ;;  %v247_v25 = vmul.f32 %v2056_v23, %v2054_v13 }
 0x388   :  { %270 = vmatpush.msrb.mxu1 %v250_v24 }
 0x389   :  { %1919 = vmatmul.msk.f32.vlgmr.msrb.gmra.mxu1 %vm175_vm8, %v247_v25 }
 0x38a   :  { %1921 = vmatpush.xpose.msk.msra.mxu1 %vm175_vm8, %v304_v60 }
 0x391   :  { %1922 = vmatmul.msk.f32.vlgmr.msra.gmra.mxu1 %vm175_vm8, %v302_v61 }
 0x3c0   :  { %v232_v26 = vpop.xlane.xlu2 %231 }
 0x3c1   :  { %v234_v27 = vsub.f32 %v225_v20, %v232_v26 }
 0x3c3   :  { %v237_v28 = vmul.f32 1.442695, %v234_v27 }
 0x3c5   :  { %2057 = vpow2.f32 %v237_v28 }
 0x3c8   :  { %v276_v29 = vpop.permute.xlu2 %275 }
 0x3c9   :  { %296 = vmatpush.msra.mxu3 %v276_v29 }
 0x3cb   :  { %v2058_v30 = vpop.eup %2057 }
 0x3cc   :  { %v242_v31 = vsel %vm175_vm8, %v2058_v30, 0.0 }
 0x3cd   :  { %243 = vadd.xlane.f32.xlu0 %v242_v31 }
 0x3d0   :  { %v490_v60 = vpop.permute.xlu2 %489 }
 0x3e1   :  { %379 = vrot.lane.b32.xlu0 %v2277_v55, %s2139_s1 }
 0x406   :  { %v272_v35 = vpop.f32.mrf.mxu1 }
 0x407   :  { %1929 = vmatmul.msk.f32.vlgmr.msrb.gmra.mxu0 %vm175_vm8, %v272_v35 }
 0x40b   :  { %361 = vmax.xlane.f32.xlu0 %v360_v36 }
 0x40e   :  { %v326_v37 = vpop.f32.mrf.mxu1 }
 0x40f   :  { %v327_v38 = vadd.f32 %v326_v37, %v2304_v5 }
 0x411   :  { %v357_v39 = vsel %vm175_vm8, %v327_v38, -inf }
 0x412   :  { %358 = vmax.xlane.f32.xlu1 %v357_v39 }
 0x41f   :  { %650 = vrot.lane.b32.xlu0 %v2277_v55, %s2766_s21 }
 0x427   :  { %680 = vrot.lane.b32.xlu0 %v2281_v57, %s2768_s22 }
 0x42f   :  { %678 = vrot.lane.b32.xlu0 %v2281_v57, %s2766_s21 }
 0x440   :  { %v244_v40 = vpop.xlane.xlu0 %243 }
 0x441   :  { %2059 = vrcp.f32 %v244_v40 }
 0x447   :  { %v2060_v41 = vpop.eup %2059 }
 0x448   :  { %v248_v42 = vmul.f32 %v2060_v41, %v2058_v30 }
 0x44a   :  { %1920 = vmatmul.msk.f32.vlgmr.msra.gmra.mxu3 %vm175_vm8, %v248_v42 }
 0x453   :  { %v380_v43 = vpop.permute.xlu0 %379 }
 0x454   :  { %400 = vmatpush.msrb.mxu3 %v380_v43 }
 0x47e   :  { %v362_v44 = vpop.xlane.xlu0 %361 }
 0x47f   :  { %v364_v45 = vsub.f32 %v355_v34, %v362_v44 }
 0x481   :  { %v367_v46 = vmul.f32 1.442695, %v364_v45  ;;  %v164_v45 = vld [vmem:[%s2752_s6 + $0x10] sm:$0xff] }
 0x482   :  { %640 = vmatpush.msrb.mxu2 %v164_v45 }
 0x483   :  { %2061 = vpow2.f32 %v367_v46 }
 0x484   :  { %v2379_v32 = vpop.f32.mrf.mxu0 }
 0x485   :  { %v359_v47 = vpop.xlane.xlu1 %358 }
 0x486   :  { %v363_v48 = vsub.f32 %v327_v38, %v359_v47 }
 0x488   :  { %v365_v49 = vmul.f32 1.442695, %v363_v48 }
 0x489   :  { %v2062_v50 = vpop.eup %2061 }
 0x48a   :  { %2063 = vpow2.f32 %v365_v49  ;;  %v372_v51 = vsel %vm175_vm8, %v2062_v50, 0.0 }
 0x48b   :  { %373 = vadd.xlane.f32.xlu2 %v372_v51 }
 0x490   :  { %v2064_v52 = vpop.eup %2063 }
 0x491   :  { %v369_v53 = vsel %vm175_vm8, %v2064_v52, 0.0  ;;  %v651_v8 = vpop.permute.xlu0 %650 }
 0x492   :  { %370 = vadd.xlane.f32.xlu1 %v369_v53 }
 0x499   :  { %v681_v20 = vpop.permute.xlu0 %680 }
 0x4a1   :  { %v679_v24 = vpop.permute.xlu0 %678 }
 0x4ab   :  { %491 = vrot.lane.b32.xlu1 %v2277_v55, %s2142_s23 }
 0x4b3   :  { %405 = vrot.lane.b32.xlu1 %v2281_v57, %s2139_s1 }
 0x4bb   :  { %519 = vrot.lane.b32.xlu1 %v2281_v57, %s2142_s23 }
 0x4c3   :  { %517 = vrot.lane.b32.xlu1 %v2281_v57, %s2772_s18  ;;  %s2780_s18 = smov 40  }
 0x4cb   :  { %652 = vrot.lane.b32.xlu1 %v2277_v55, %s2768_s22 }
 0x4cd   :  { %v298_v54 = vpop.f32.mrf.mxu3 }
 0x4ce   :  { %1930 = vmatmul.msk.f32.gmra.mxu0 %vm175_vm8, %v298_v54 }
 0x4fe   :  { %v374_v61 = vpop.xlane.xlu2 %373 }
 0x505   :  { %v371_v56 = vpop.xlane.xlu1 %370 }
 0x506   :  { %2065 = vrcp.f32 %v371_v56 }
 0x507   :  { %2067 = vrcp.f32 %v374_v61 }
 0x50c   :  { %v2066_v58 = vpop.eup %2065 }
 0x50d   :  { %v377_v59 = vmul.f32 %v2066_v58, %v2064_v52  ;;  %v2068_v63 = vpop.eup %2067 }
 0x50e   :  { %v378_v2 = vmul.f32 %v2068_v63, %v2062_v50 }
 0x50f   :  { %1925 = vmatmul.msk.f32.vlgmr.msrb.gmra.mxu3 %vm175_vm8, %v377_v59 }
 0x51d   :  { %v492_v62 = vpop.permute.xlu1 %491 }
 0x51e   :  { %1931 = vmatpush.xpose.msk.msra.mxu3 %vm175_vm8, %v492_v62 }
 0x521   :  { %1932 = vmatmul.msk.f32.vlgmr.msra.gmra.mxu3 %vm175_vm8, %v490_v60 }
 0x525   :  { %v406_v3 = vpop.permute.xlu1 %405 }
 0x526   :  { %426 = vmatpush.msrb.mxu1 %v406_v3  ;;  %v165_v3 = vld [vmem:[%s2752_s6 + $0x18] sm:$0xff] }
 0x527   :  { %1926 = vmatmul.msk.f32.vlgmr.msrb.gmra.mxu1 %vm175_vm8, %v378_v2 }
 0x52d   :  { %v520_v4 = vpop.permute.xlu1 %519 }
 0x52e   :  { %1933 = vmatpush.xpose.msk.msra.mxu1 %vm175_vm8, %v520_v4 }
 0x535   :  { %v518_v6 = vpop.permute.xlu1 %517 }
 0x536   :  { %1934 = vmatmul.msk.f32.vlgmr.msra.gmra.mxu1 %vm175_vm8, %v518_v6 }
 0x53d   :  { %v653_v7 = vpop.permute.xlu1 %652 }
 0x53e   :  { %1939 = vmatpush.xpose.msk.msra.mxu0 %vm175_vm8, %v653_v7 }
 0x541   :  { %1940 = vmatmul.msk.f32.vlgmr.msra.gmra.mxu0 %vm175_vm8, %v651_v8 }
 0x54b   :  { %v2381_v33 = vpop.f32.mrf.mxu0 }
 0x592   :  { %v402_v11 = vpop.f32.mrf.mxu3 }
 0x593   :  { %1927 = vmatmul.msk.f32.vlgmr.msra.gmra.mxu2 %vm175_vm8, %v402_v11 }
 0x5a4   :  { %v428_v12 = vpop.f32.mrf.mxu1  ;;  %v514_v13 = vpop.f32.mrf.mxu3 }
 0x5a5   :  { %v515_v14 = vadd.f32 %v514_v13, %v2304_v5  ;;  %1928 = vmatmul.msk.f32.gmra.mxu2 %vm175_vm8, %v428_v12 }
 0x5a7   :  { %v545_v15 = vsel %vm175_vm8, %v515_v14, -inf }
 0x5a8   :  { %546 = vmax.xlane.f32.xlu1 %v545_v15 }
 0x5b3   :  { %v542_v16 = vpop.f32.mrf.mxu1 }
 0x5b4   :  { %v543_v17 = vadd.f32 %v542_v16, %v2314_v18 }
 0x5b6   :  { %v548_v19 = vsel %vm175_vm8, %v543_v17, -inf }
 0x5b7   :  { %549 = vmax.xlane.f32.xlu0 %v548_v19  ;;  %v2034_v19 = vld [vmem:[%s2753_s7] ss:$0 sm:$0xff] }
 0x5be   :  { %v675_v34 = vpop.f32.mrf.mxu0 }
 0x5bf   :  { %v676_v35 = vadd.f32 %v675_v34, %v2304_v5 }
 0x5c1   :  { %v706_v36 = vsel %vm175_vm8, %v676_v35, -inf }
 0x5cb   :  { %728 = vrot.lane.b32.xlu0 %v2277_v55, %s2764_s29 }
 0x616   :  { %v454_v11 = vpop.f32.mrf.mxu2 }
 0x61b   :  { %v547_v21 = vpop.xlane.xlu1 %546 }
 0x61c   :  { %v551_v22 = vsub.f32 %v515_v14, %v547_v21  ;;  %v484_v14 = vadd.f32 %v2379_v32, %v454_v11 }
 0x61e   :  { %v553_v23 = vmul.f32 1.442695, %v551_v22 }
 0x620   :  { %2069 = vpow2.f32 %v553_v23 }
 0x626   :  { %v2070_v25 = vpop.eup %2069 }
 0x627   :  { %v557_v26 = vsel %vm175_vm8, %v2070_v25, 0.0 }
 0x628   :  { %558 = vadd.xlane.f32.xlu2 %v557_v26  ;;  %v457_v12 = vpop.f32.mrf.mxu2 }
 0x62a   :  { %v550_v27 = vpop.xlane.xlu0 %549 }
 0x62b   :  { %v552_v28 = vsub.f32 %v543_v17, %v550_v27 }
 0x62d   :  { %v555_v29 = vmul.f32 1.442695, %v552_v28 }
 0x62f   :  { %2071 = vpow2.f32 %v555_v29 }
 0x635   :  { %v2072_v30 = vpop.eup %2071 }
 0x636   :  { %v560_v31 = vsel %vm175_vm8, %v2072_v30, 0.0 }
 0x637   :  { %561 = vadd.xlane.f32.xlu1 %v560_v31 }
 0x63d   :  { %v729_v56 = vpop.permute.xlu0 %728 }
 0x640   :  { %567 = vrot.lane.b32.xlu2 %v2277_v55, %s2770_s0 }
 0x669   :  { %707 = vmax.xlane.f32.xlu2 %v706_v36 }
 0x69b   :  { %v559_v37 = vpop.xlane.xlu2 %558 }
 0x69c   :  { %2073 = vrcp.f32 %v559_v37  ;;  %v878_v37 = vld [vmem:[%s2757_s10 + $0x18] sm:$0xff] }
 0x6a2   :  { %v2074_v38 = vpop.eup %2073 }
 0x6a3   :  { %v565_v39 = vmul.f32 %v2074_v38, %v2070_v25  ;;  %v568_v40 = vpop.permute.xlu2 %567  ;;  %v875_v38 = vld [vmem:[%s2757_s10] sm:$0xff] }
 0x6a4   :  { %588 = vmatpush.msrb.mxu3 %v568_v40 }
 0x6a5   :  { %1935 = vmatmul.msk.f32.vlgmr.msrb.gmra.mxu3 %vm175_vm8, %v565_v39 }
 0x6a6   :  { %1941 = vmatpush.xpose.msk.msra.mxu3 %vm175_vm8, %v681_v20 }
 0x6aa   :  { %v562_v50 = vpop.xlane.xlu1 %561  ;;  %801 = vmatpush.msrb.mxu3 %v165_v3  ;;  %v915_v3 = vld [vmem:[%s2758_s12 + $0x8] sm:$0xff] }
 0x6ad   :  { %1942 = vmatmul.msk.f32.vlgmr.msra.gmra.mxu3 %vm175_vm8, %v679_v24 }
 0x6dc   :  { %v708_v55 = vpop.xlane.xlu2 %707 }
 0x6dd   :  { %v712_v41 = vsub.f32 %v676_v35, %v708_v55 }
 0x6df   :  { %v714_v42 = vmul.f32 1.442695, %v712_v41 }
 0x6e1   :  { %2075 = vpow2.f32 %v714_v42 }
 0x6e2   :  { %2077 = vrcp.f32 %v562_v50  ;;  %v2036_v50 = vld [vmem:[%s2755_s9] ss:$0 sm:$0xff] }
 0x6e7   :  { %v2076_v43 = vpop.eup %2075 }
 0x6e8   :  { %v718_v44 = vsel %vm175_vm8, %v2076_v43, 0.0  ;;  %v2078_v52 = vpop.eup %2077 }
 0x6e9   :  { %719 = vadd.xlane.f32.xlu1 %v718_v44  ;;  %v566_v53 = vmul.f32 %v2078_v52, %v2072_v30 }
 0x702   :  { %593 = vrot.lane.b32.xlu1 %v2281_v57, %s2770_s0 }
 0x728   :  { %v590_v46 = vpop.f32.mrf.mxu3 }
 0x729   :  { %1937 = vmatmul.msk.f32.vlgmr.msrb.gmra.mxu2 %vm175_vm8, %v590_v46 }
 0x730   :  { %v703_v47 = vpop.f32.mrf.mxu3 }
 0x731   :  { %v704_v48 = vadd.f32 %v703_v47, %v2314_v18  ;;  %v2035_v47 = vld [vmem:[%s2754_s8] ss:$0 sm:$0xff] }
 0x733   :  { %v709_v49 = vsel %vm175_vm8, %v704_v48, -inf }
 0x734   :  { %710 = vmax.xlane.f32.xlu2 %v709_v49 }
 0x74c   :  { %754 = vrot.lane.b32.xlu2 %v2281_v57, %s2764_s29 }
 0x75c   :  { %v720_v51 = vpop.xlane.xlu1 %719 }
 0x75d   :  { %2079 = vrcp.f32 %v720_v51 }
 0x763   :  { %v2080_v58 = vpop.eup %2079 }
 0x764   :  { %v726_v59 = vmul.f32 %v2080_v58, %v2076_v43  ;;  %v918_v58 = vld [vmem:[%s2758_s12 + $0x20] sm:$0xff] }
 0x774   :  { %v594_v54 = vpop.permute.xlu1 %593 }
 0x775   :  { %614 = vmatpush.msrb.mxu1 %v594_v54  ;;  %v920_v54 = vld [vmem:[%s2758_s12 + $0x30] sm:$0xff] }
 0x776   :  { %1936 = vmatmul.msk.f32.vlgmr.msrb.gmra.mxu1 %vm175_vm8, %v566_v53  ;;  %v921_v53 = vld [vmem:[%s2758_s12 + $0x38] sm:$0xff] }
 0x777   :  { %749 = vmatpush.msra.mxu1 %v729_v56  ;;  %941 = vmatpush.msra.mxu2 %v921_v53  ;;  %v919_v56 = vld [vmem:[%s2758_s12 + $0x28] sm:$0xff] }
 0x779   :  { %901 = vmatpush.msrb.mxu1 %v878_v37  ;;  %942 = vmatpush.msra.mxu2 %v920_v54  ;;  %v2032_v54 = vld [vmem:[%s2748_s3 + $0x1] ss:$0 sm:$0xff]  ;;  %s2776_s3 = smov 112  }
 0x77b   :  { %943 = vmatpush.msra.mxu2 %v919_v56 }
 0x77d   :  { %944 = vmatpush.msra.mxu2 %v918_v58 }
 0x77e   :  { %1943 = vmatmul.msk.f32.vlgmr.msra.gmra.mxu1 %vm175_vm8, %v726_v59  ;;  %v917_v59 = vld [vmem:[%s2758_s12 + $0x18] sm:$0xff] }
 0x77f   :  { %945 = vmatpush.msra.mxu2 %v917_v59 }
 0x7a7   :  { %v711_v60 = vpop.xlane.xlu2 %710 }
 0x7a8   :  { %v713_v61 = vsub.f32 %v704_v48, %v711_v60 }
 0x7aa   :  { %v716_v62 = vmul.f32 1.442695, %v713_v61 }
 0x7ac   :  { %2081 = vpow2.f32 %v716_v62  ;;  %v642_v13 = vpop.f32.mrf.mxu2 }
 0x7ad   :  { %v648_v15 = vadd.f32 %v642_v13, %v484_v14 }
 0x7af   :  { %v755_v57 = vpop.permute.xlu2 %754 }
 0x7b0   :  { %775 = vmatpush.msrb.mxu0 %v755_v57 }
 0x7b2   :  { %v2082_v63 = vpop.eup %2081 }
 0x7b3   :  { %v721_v2 = vsel %vm175_vm8, %v2082_v63, 0.0 }
 0x7b4   :  { %722 = vadd.xlane.f32.xlu1 %v721_v2  ;;  %v916_v2 = vld [vmem:[%s2758_s12 + $0x10] sm:$0xff] }
 0x7b5   :  { %946 = vmatpush.msra.mxu2 %v916_v2  ;;  %v2039_v2 = vld [vmem:[%s2749_s5 + $0x1] ss:$0 sm:$0xff] }
 0x7b7   :  { %947 = vmatpush.msra.mxu2 %v915_v3 }
 0x7f3   :  { %v616_v4 = vpop.f32.mrf.mxu1 }
 0x7f4   :  { %1938 = vmatmul.msk.f32.gmra.mxu2 %vm175_vm8, %v616_v4  ;;  %v914_v4 = vld [vmem:[%s2758_s12] sm:$0xff] }
 0x7f5   :  { %948 = vmatpush.msra.mxu2 %v914_v4 }
 0x7fb   :  { %v751_v6 = vpop.f32.mrf.mxu1 }
 0x7fc   :  { %1945 = vmatmul.msk.f32.vlgmr.msrb.gmra.mxu3 %vm175_vm8, %v751_v6  ;;  %v2037_v6 = vld [vmem:[%s2756_s11] ss:$0 sm:$0xff] }
 0x827   :  { %v723_v7 = vpop.xlane.xlu1 %722 }
 0x828   :  { %2083 = vrcp.f32 %v723_v7 }
 0x82e   :  { %v2084_v8 = vpop.eup %2083 }
 0x82f   :  { %v727_v9 = vmul.f32 %v2084_v8, %v2082_v63 }
 0x831   :  { %1944 = vmatmul.msk.f32.vlgmr.msrb.gmra.mxu0 %vm175_vm8, %v727_v9 }
 0x877   :  { %v645_v29 = vpop.f32.mrf.mxu2 }
 0x87f   :  { %v803_v16 = vpop.f32.mrf.mxu3 }
 0x880   :  { %v809_v17 = vadd.f32 %v803_v16, %v648_v15 }
 0x882   :  { %v811_v20 = vadd.f32 %v809_v17, %v2233_v0  ;;  %v487_v0 = vadd.f32 %v2381_v33, %v457_v12  ;;  %v877_v33 = vld [vmem:[%s2757_s10 + $0x10] sm:$0xff] }
 0x883   :  { %902 = vmatpush.msrb.mxu1 %v877_v33 }
 0x884   :  { %v2413_v21 = vadd.f32 %v2034_v19, %v811_v20  ;;  %v649_v30 = vadd.f32 %v645_v29, %v487_v0 }
 0x886   :  { %v821_v22 = vsel %vm63_vm0, %v2413_v21, 0.0 }
 0x887   :  { %822 = vadd.xlane.f32.xlu0 %v821_v22 }
 0x8ae   :  { %v777_v23 = vpop.f32.mrf.mxu0 }
 0x8af   :  { %1946 = vmatmul.msk.f32.gmra.mxu3 %vm175_vm8, %v777_v23 }
 0x8fa   :  { %v823_v24 = vpop.xlane.xlu0 %822 }
 0x8fb   :  { %v827_v25 = vmul.f32 %v823_v24, %v2244_v10 }
 0x8fd   :  { %v829_v26 = vsub.f32 %v2413_v21, %v827_v25 }
 0x8ff   :  { %v831_v27 = vmul.f32 %v829_v26, %v829_v26 }
 0x901   :  { %v833_v28 = vsel %vm63_vm0, %v831_v27, 0.0 }
 0x902   :  { %834 = vadd.xlane.f32.xlu2 %v833_v28 }
 0x932   :  { %v806_v31 = vpop.f32.mrf.mxu3 }
 0x933   :  { %v810_v32 = vadd.f32 %v806_v31, %v649_v30 }
 0x935   :  { %v812_v34 = vadd.f32 %v810_v32, %v2238_v1  ;;  %v876_v1 = vld [vmem:[%s2757_s10 + $0x8] sm:$0xff] }
 0x936   :  { %903 = vmatpush.msrb.mxu1 %v876_v1 }
 0x937   :  { %v2423_v35 = vadd.f32 %v2034_v19, %v812_v34 }
 0x938   :  { %904 = vmatpush.msrb.mxu1 %v875_v38 }
 0x939   :  { %v824_v36 = vsel %vm63_vm0, %v2423_v35, 0.0 }
 0x93a   :  { %825 = vadd.xlane.f32.xlu1 %v824_v36 }
 0x975   :  { %v835_v39 = vpop.xlane.xlu2 %834 }
 0x976   :  { %v839_v40 = vmul.f32 %v835_v39, %v2244_v10 }
 0x978   :  { %v841_v55 = vadd.f32 1e-05, %v839_v40 }
 0x97a   :  { %2085 = vrsqrt.f32 %v841_v55  ;;  %vm849_vm10 = vweird.f32 %v841_v55 }
 0x980   :  { %v2086_v41 = vpop.eup %2085 }
 0x981   :  { %v844_v42 = vmul.f32 %v2086_v41, %v841_v55  ;;  %vm850_vm9 = vweird.f32 %v2086_v41  ;;  %v1956_v55 = vld [vmem:[%s2750_s4 + $0x38] sm:$0xff] }
 0x982   :  { %vm851_vm11 = vmor %vm849_vm10, %vm850_vm9  ;;  %1044 = vmatpush.msra.mxu0 %v1956_v55 }
 0x983   :  { %v845_v43 = vmul.f32 %v2086_v41, %v844_v42  ;;  %v1954_v42 = vld [vmem:[%s2750_s4 + $0x28] sm:$0xff] }
 0x985   :  { %v846_v44 = vmul.f32 0.5, %v845_v43 }
 0x987   :  { %v847_v45 = vsub.f32 1.5, %v846_v44 }
 0x989   :  { %v848_v46 = vmul.f32 %v2086_v41, %v847_v45 }
 0x98b   :  { %v852_v48 = vsel %vm851_vm11, %v2086_v41, %v848_v46  ;;  %v1955_v41 = vld [vmem:[%s2750_s4 + $0x30] sm:$0xff] }
 0x98c   :  { %v863_v49 = vmul.f32 %v852_v48, %v829_v26  ;;  %v2038_v26 = vld [vmem:[%s2759_s13] ss:$0 sm:$0xff]  ;;  %1045 = vmatpush.msra.mxu0 %v1955_v41 }
 0x98e   :  { %v868_v51 = vmul.f32 %v2035_v47, %v863_v49  ;;  %1046 = vmatpush.msra.mxu0 %v1954_v42 }
 0x990   :  { %v873_v52 = vadd.f32 %v2036_v50, %v868_v51 }
 0x992   :  { %1947 = vmatmul.msk.f32.vlgmr.msrb.gmra.mxu1 %vm63_vm0, %v873_v52  ;;  %v2031_v52 = vld [vmem:[%s2747_s2 + $0x1] ss:$0 sm:$0xff] }
 0x9ad   :  { %v826_v60 = vpop.xlane.xlu1 %825 }
 0x9ae   :  { %v828_v61 = vmul.f32 %v826_v60, %v2244_v10 }
 0x9b0   :  { %v830_v62 = vsub.f32 %v2423_v35, %v828_v61 }
 0x9b2   :  { %v832_v57 = vmul.f32 %v830_v62, %v830_v62 }
 0x9b4   :  { %v836_v63 = vsel %vm63_vm0, %v832_v57, 0.0 }
 0x9b5   :  { %837 = vadd.xlane.f32.xlu1 %v836_v63 }
 0xa0f   :  { %v906_v7 = vpop.f32.mrf.mxu1 }
 0xa10   :  { %v907_v8 = vadd.f32 %v2037_v6, %v906_v7 }
 0xa12   :  { %v912_v9 = vmax.f32 %v907_v8, 0.0 }
 0xa14   :  { %1949 = vmatmul.msk.f32.vlgmr.msra.gmra.mxu2 %vm926_vm12, %v912_v9 }
 0xa28   :  { %v838_v11 = vpop.xlane.xlu1 %837 }
 0xa29   :  { %v840_v12 = vmul.f32 %v838_v11, %v2244_v10 }
 0xa2b   :  { %v842_v13 = vadd.f32 1e-05, %v840_v12 }
 0xa2d   :  { %2087 = vrsqrt.f32 %v842_v13  ;;  %vm859_vm14 = vweird.f32 %v842_v13 }
 0xa33   :  { %v2088_v14 = vpop.eup %2087 }
 0xa34   :  { %v854_v15 = vmul.f32 %v2088_v14, %v842_v13  ;;  %vm860_vm13 = vweird.f32 %v2088_v14 }
 0xa35   :  { %vm861_vm15 = vmor %vm859_vm14, %vm860_vm13 }
 0xa36   :  { %v855_v16 = vmul.f32 %v2088_v14, %v854_v15 }
 0xa38   :  { %v856_v17 = vmul.f32 0.5, %v855_v16 }
 0xa3a   :  { %v857_v19 = vsub.f32 1.5, %v856_v17 }
 0xa3c   :  { %v858_v20 = vmul.f32 %v2088_v14, %v857_v19 }
 0xa3e   :  { %v862_v22 = vsel %vm861_vm15, %v2088_v14, %v858_v20 }
 0xa3f   :  { %v864_v23 = vmul.f32 %v862_v22, %v830_v62 }
 0xa41   :  { %v869_v24 = vmul.f32 %v2035_v47, %v864_v23 }
 0xa43   :  { %v874_v25 = vadd.f32 %v2036_v50, %v869_v24 }
 0xa45   :  { %1948 = vmatmul.msk.f32.gmra.mxu1 %vm63_vm0, %v874_v25 }
 0xa97   :  { %v950_v27 = vpop.f32.mrf.mxu2 }
 0xa98   :  { %v951_v28 = vadd.f32 %v2038_v26, %v950_v27 }
 0xa9a   :  { %v2484_v29 = vadd.f32 %v951_v28, %v2413_v21 }
 0xa9c   :  { %v962_v0 = vsel %vm63_vm0, %v2484_v29, 0.0 }
 0xa9d   :  { %963 = vadd.xlane.f32.xlu0 %v962_v0 }
 0xac2   :  { %v909_v30 = vpop.f32.mrf.mxu1 }
 0xac3   :  { %v910_v31 = vadd.f32 %v2037_v6, %v909_v30 }
 0xac5   :  { %v913_v32 = vmax.f32 %v910_v31, 0.0 }
 0xac7   :  { %1950 = vmatmul.msk.f32.gmra.mxu2 %vm926_vm12, %v913_v32 }
 0xb10   :  { %v964_v34 = vpop.xlane.xlu0 %963 }
 0xb11   :  { %v968_v36 = vmul.f32 %v964_v34, %v2244_v10 }
 0xb13   :  { %v970_v37 = vsub.f32 %v2484_v29, %v968_v36 }
 0xb15   :  { %v972_v33 = vmul.f32 %v970_v37, %v970_v37 }
 0xb17   :  { %v974_v1 = vsel %vm63_vm0, %v972_v33, 0.0 }
 0xb18   :  { %975 = vadd.xlane.f32.xlu1 %v974_v1 }
 0xb4a   :  { %v953_v21 = vpop.f32.mrf.mxu2 }
 0xb4b   :  { %v954_v38 = vadd.f32 %v2038_v26, %v953_v21 }
 0xb4d   :  { %v2493_v39 = vadd.f32 %v954_v38, %v2423_v35  ;;  %v1953_v35 = vld [vmem:[%s2750_s4 + $0x20] sm:$0xff] }
 0xb4e   :  { %1047 = vmatpush.msra.mxu0 %v1953_v35 }
 0xb4f   :  { %v965_v40 = vsel %vm63_vm0, %v2493_v39, 0.0 }
 0xb50   :  { %966 = vadd.xlane.f32.xlu0 %v965_v40 }
 0xb8b   :  { %v976_v43 = vpop.xlane.xlu1 %975 }
 0xb8c   :  { %v980_v44 = vmul.f32 %v976_v43, %v2244_v10 }
 0xb8e   :  { %v982_v45 = vadd.f32 1e-05, %v980_v44 }
 0xb90   :  { %2089 = vrsqrt.f32 %v982_v45  ;;  %vm990_vm2 = vweird.f32 %v982_v45 }
 0xb96   :  { %v2090_v46 = vpop.eup %2089 }
 0xb97   :  { %v985_v47 = vmul.f32 %v2090_v46, %v982_v45  ;;  %vm991_vm1 = vweird.f32 %v2090_v46 }
 0xb98   :  { %vm992_vm3 = vmor %vm990_vm2, %vm991_vm1 }
 0xb99   :  { %v986_v48 = vmul.f32 %v2090_v46, %v985_v47 }
 0xb9b   :  { %v987_v49 = vmul.f32 0.5, %v986_v48 }
 0xb9d   :  { %v988_v50 = vsub.f32 1.5, %v987_v49 }
 0xb9f   :  { %v989_v51 = vmul.f32 %v2090_v46, %v988_v50 }
 0xba1   :  { %v993_v53 = vsel %vm992_vm3, %v2090_v46, %v989_v51 }
 0xba2   :  { %v1004_v56 = vmul.f32 %v993_v53, %v970_v37 }
 0xba4   :  { %v1009_v58 = vmul.f32 %v2031_v52, %v1004_v56 }
 0xba6   :  { %v1014_v59 = vadd.f32 %v2032_v54, %v1009_v58 }
 0xba8   :  { %1958 = vmatmul.msk.f32.vlgmr.msra.gmra.mxu0 %vm63_vm0, %v1014_v59 }
 0xbc3   :  { %v967_v60 = vpop.xlane.xlu0 %966 }
 0xbc4   :  { %v969_v61 = vmul.f32 %v967_v60, %v2244_v10 }
 0xbc6   :  { %v971_v62 = vsub.f32 %v2493_v39, %v969_v61 }
 0xbc8   :  { %v973_v57 = vmul.f32 %v971_v62, %v971_v62 }
 0xbca   :  { %v977_v63 = vsel %vm63_vm0, %v973_v57, 0.0 }
 0xbcb   :  { %978 = vadd.xlane.f32.xlu1 %v977_v63 }
 0xc25   :  { %v1049_v3 = vpop.f32.mrf.mxu0 }
 0xc26   :  { %v2523_v4 = vadd.f32 %v2039_v2, %v1049_v3  ;;  %v1961_v3 = vld [vmem:[%s2752_s6 + $0x28] sm:$0xff] }
 0xc28   :  { %1188 = vrot.lane.b32.xlu1 %v2523_v4, %s2136_s27  ;;  %1190 = vrot.lane.b32.xlu0 %v2523_v4, %s2135_s26 }
 0xc29   :  { %1061 = vrot.lane.b32.xlu2 %v2523_v4, %s2134_s25 }
 0xc3e   :  { %v979_v6 = vpop.xlane.xlu1 %978 }
 0xc3f   :  { %v981_v7 = vmul.f32 %v979_v6, %v2244_v10 }
 0xc41   :  { %v983_v8 = vadd.f32 1e-05, %v981_v7 }
 0xc43   :  { %2091 = vrsqrt.f32 %v983_v8  ;;  %vm1000_vm5 = vweird.f32 %v983_v8 }
 0xc49   :  { %v2092_v9 = vpop.eup %2091 }
 0xc4a   :  { %v995_v11 = vmul.f32 %v2092_v9, %v983_v8  ;;  %vm1001_vm4 = vweird.f32 %v2092_v9 }
 0xc4b   :  { %vm1002_vm6 = vmor %vm1000_vm5, %vm1001_vm4 }
 0xc4c   :  { %v996_v12 = vmul.f32 %v2092_v9, %v995_v11 }
 0xc4e   :  { %v997_v13 = vmul.f32 0.5, %v996_v12 }
 0xc50   :  { %v998_v14 = vsub.f32 1.5, %v997_v13 }
 0xc52   :  { %v999_v15 = vmul.f32 %v2092_v9, %v998_v14 }
 0xc54   :  { %v1003_v16 = vsel %vm1002_vm6, %v2092_v9, %v999_v15 }
 0xc55   :  { %v1005_v17 = vmul.f32 %v1003_v16, %v971_v62 }
 0xc57   :  { %v1010_v19 = vmul.f32 %v2031_v52, %v1005_v17 }
 0xc59   :  { %v1015_v20 = vadd.f32 %v2032_v54, %v1010_v19 }
 0xc5b   :  { %1959 = vmatmul.msk.f32.gmra.mxu0 %vm63_vm0, %v1015_v20 }
 0xc83   :  { %v1062_v22 = vpop.permute.xlu2 %1061 }
 0xc84   :  { %1964 = vmatpush.xpose.msk.msra.mxu3 %vm175_vm8, %v1062_v22 }
 0xc87   :  { %1965 = vmatmul.msk.f32.vlgmr.msra.gmra.mxu3 %vm175_vm8, %v2523_v4 }
 0xc9a   :  { %v1191_v23 = vpop.permute.xlu0 %1190  ;;  %v1189_v24 = vpop.permute.xlu1 %1188 }
 0xc9b   :  { %1970 = vmatpush.xpose.msk.msrb.mxu3 %vm175_vm8, %v1191_v23 }
 0xc9e   :  { %1971 = vmatmul.msk.f32.vlgmr.msrb.gmra.mxu3 %vm175_vm8, %v1189_v24 }
 0xc9f   :  { %1339 = vmatpush.msra.mxu3 %v1961_v3 }
 0xcd8   :  { %v1052_v25 = vpop.f32.mrf.mxu0 }
 0xcd9   :  { %v2538_v26 = vadd.f32 %v2039_v2, %v1052_v25  ;;  %v1960_v2 = vld [vmem:[%s2752_s6 + $0x20] sm:$0xff] }
 0xcdb   :  { %1088 = vrot.lane.b32.xlu0 %v2538_v26, %s2134_s25 }
 0xd0a   :  { %v1084_v27 = vpop.f32.mrf.mxu3 }
 0xd0b   :  { %v1085_v28 = vadd.f32 %v1084_v27, %v2304_v5 }
 0xd0d   :  { %v1114_v0 = vsel %vm175_vm8, %v1085_v28, -inf }
 0xd0e   :  { %1115 = vmax.xlane.f32.xlu2 %v1114_v0 }
 0xd21   :  { %v1213_v30 = vpop.f32.mrf.mxu3 }
 0xd22   :  { %v1214_v31 = vadd.f32 %v1213_v30, %v2304_v5 }
 0xd24   :  { %v1244_v32 = vsel %vm175_vm8, %v1214_v31, -inf }
 0xd25   :  { %1245 = vmax.xlane.f32.xlu1 %v1244_v32 }
 0xd26   :  { %1266 = vrot.lane.b32.xlu2 %v2523_v4, %s2139_s1 }
 0xd3e   :  { %1136 = vrot.lane.b32.xlu1 %v2523_v4, %s2137_s30 }
 0xd46   :  { %1378 = vrot.lane.b32.xlu1 %v2523_v4, %s2142_s23 }
 0xd4d   :  { %v1089_v34 = vpop.permute.xlu0 %1088 }
 0xd4e   :  { %1966 = vmatpush.xpose.msk.msra.mxu1 %vm175_vm8, %v1089_v34 }
 0xd51   :  { %1967 = vmatmul.msk.f32.vlgmr.msra.gmra.mxu1 %vm175_vm8, %v2538_v26 }
 0xd81   :  { %v1116_v36 = vpop.xlane.xlu2 %1115 }
 0xd82   :  { %v1120_v37 = vsub.f32 %v1085_v28, %v1116_v36 }
 0xd84   :  { %v1122_v33 = vmul.f32 1.442695, %v1120_v37 }
 0xd86   :  { %2093 = vpow2.f32 %v1122_v33 }
 0xd89   :  { %v1267_v43 = vpop.permute.xlu2 %1266 }
 0xd8c   :  { %v2094_v1 = vpop.eup %2093 }
 0xd8d   :  { %v1126_v21 = vsel %vm175_vm8, %v2094_v1, 0.0 }
 0xd8e   :  { %1127 = vadd.xlane.f32.xlu0 %v1126_v21 }
 0xd98   :  { %v1246_v38 = vpop.xlane.xlu1 %1245 }
 0xd99   :  { %v1250_v40 = vsub.f32 %v1214_v31, %v1246_v38 }
 0xd9b   :  { %v1252_v55 = vmul.f32 1.442695, %v1250_v40 }
 0xd9d   :  { %2095 = vpow2.f32 %v1252_v55 }
 0xda2   :  { %1218 = vrot.lane.b32.xlu0 %v2538_v26, %s2135_s26 }
 0xda3   :  { %v2096_v41 = vpop.eup %2095 }
 0xda4   :  { %v1256_v42 = vsel %vm175_vm8, %v2096_v41, 0.0 }
 0xda5   :  { %1257 = vadd.xlane.f32.xlu2 %v1256_v42 }
 0xdaa   :  { %1216 = vrot.lane.b32.xlu0 %v2538_v26, %s2136_s27 }
 0xdb0   :  { %v1137_v35 = vpop.permute.xlu1 %1136 }
 0xdb1   :  { %1157 = vmatpush.msrb.mxu2 %v1137_v35 }
 0xdb3   :  { %1287 = vmatpush.msra.mxu2 %v1267_v43 }
 0xdb8   :  { %v1379_v50 = vpop.permute.xlu1 %1378 }
 0xdbd   :  { %1376 = vrot.lane.b32.xlu2 %v2523_v4, %s2776_s3 }
 0xdc5   :  { %1162 = vrot.lane.b32.xlu2 %v2538_v26, %s2137_s30  ;;  %s2777_s30 = smov 48  }
 0xdce   :  { %v1111_v44 = vpop.f32.mrf.mxu1 }
 0xdcf   :  { %v1112_v45 = vadd.f32 %v1111_v44, %v2314_v18  ;;  %v1962_v44 = vld [vmem:[%s2752_s6 + $0x30] sm:$0xff] }
 0xdd0   :  { %1527 = vmatpush.msrb.mxu3 %v1962_v44 }
 0xdd1   :  { %v1117_v46 = vsel %vm175_vm8, %v1112_v45, -inf }
 0xdd4   :  { %1118 = vmax.xlane.f32.xlu0 %v1117_v46 }
 0xe01   :  { %v1128_v47 = vpop.xlane.xlu0 %1127 }
 0xe02   :  { %2097 = vrcp.f32 %v1128_v47 }
 0xe08   :  { %v2098_v48 = vpop.eup %2097 }
 0xe09   :  { %v1134_v49 = vmul.f32 %v2098_v48, %v2094_v1 }
 0xe0b   :  { %1968 = vmatmul.msk.f32.vlgmr.msrb.gmra.mxu2 %vm175_vm8, %v1134_v49 }
 0xe0c   :  { %1980 = vmatpush.xpose.msk.msrb.mxu2 %vm175_vm8, %v1379_v50 }
 0xe14   :  { %v1219_v51 = vpop.permute.xlu0 %1218 }
 0xe15   :  { %1972 = vmatpush.xpose.msk.msrb.mxu1 %vm175_vm8, %v1219_v51 }
 0xe18   :  { %v1258_v52 = vpop.xlane.xlu2 %1257 }
 0xe19   :  { %2099 = vrcp.f32 %v1258_v52  ;;  %1368 = vmatpush.msra.mxu1 %v1960_v2 }
 0xe1c   :  { %v1217_v53 = vpop.permute.xlu0 %1216 }
 0xe1d   :  { %1973 = vmatmul.msk.f32.vlgmr.msrb.gmra.mxu1 %vm175_vm8, %v1217_v53 }
 0xe1f   :  { %v2100_v54 = vpop.eup %2099 }
 0xe20   :  { %v1264_v56 = vmul.f32 %v2100_v54, %v2096_v41  ;;  %v1377_v58 = vpop.permute.xlu2 %1376 }
 0xe22   :  { %1974 = vmatmul.msk.f32.vlgmr.msra.gmra.mxu2 %vm175_vm8, %v1264_v56 }
 0xe28   :  { %v1163_v59 = vpop.permute.xlu2 %1162 }
 0xe29   :  { %1183 = vmatpush.msrb.mxu0 %v1163_v59 }
 0xe2a   :  { %1981 = vmatmul.msk.f32.vlgmr.msrb.gmra.mxu2 %vm175_vm8, %v1377_v58 }
 0xe47   :  { %v1119_v60 = vpop.xlane.xlu0 %1118 }
 0xe48   :  { %v1121_v61 = vsub.f32 %v1112_v45, %v1119_v60 }
 0xe4a   :  { %v1124_v62 = vmul.f32 1.442695, %v1121_v61 }
 0xe4c   :  { %2101 = vpow2.f32 %v1124_v62 }
 0xe52   :  { %v2102_v57 = vpop.eup %2101 }
 0xe53   :  { %v1129_v63 = vsel %vm175_vm8, %v2102_v57, 0.0 }
 0xe54   :  { %1130 = vadd.xlane.f32.xlu1 %v1129_v63 }
 0xe6d   :  { %1406 = vrot.lane.b32.xlu1 %v2538_v26, %s2142_s23  ;;  %s2778_s23 = smov 72  }
 0xe8e   :  { %v1159_v6 = vpop.f32.mrf.mxu2 }
 0xe8f   :  { %1978 = vmatmul.msk.f32.vlgmr.msra.gmra.mxu1 %vm175_vm8, %v1159_v6 }
 0xe9a   :  { %v1241_v7 = vpop.f32.mrf.mxu1 }
 0xe9b   :  { %v1242_v8 = vadd.f32 %v1241_v7, %v2314_v18 }
 0xe9d   :  { %v1247_v9 = vsel %vm175_vm8, %v1242_v8, -inf }
 0xe9e   :  { %1248 = vmax.xlane.f32.xlu2 %v1247_v9 }
 0xea5   :  { %v1289_v11 = vpop.f32.mrf.mxu2 }
 0xea6   :  { %1976 = vmatmul.msk.f32.vlgmr.msra.gmra.mxu3 %vm175_vm8, %v1289_v11 }
 0xead   :  { %v1401_v12 = vpop.f32.mrf.mxu2 }
 0xeae   :  { %v1402_v13 = vadd.f32 %v1401_v12, %v2304_v5 }
 0xeb0   :  { %v1432_v14 = vsel %vm175_vm8, %v1402_v13, -inf }
 0xeb1   :  { %1433 = vmax.xlane.f32.xlu0 %v1432_v14 }
 0xeb6   :  { %1404 = vrot.lane.b32.xlu2 %v2538_v26, %s2776_s3 }
 0xec5   :  { %1292 = vrot.lane.b32.xlu0 %v2538_v26, %s2139_s1 }
 0xec7   :  { %v1131_v15 = vpop.xlane.xlu1 %1130 }
 0xec8   :  { %2103 = vrcp.f32 %v1131_v15 }
 0xecd   :  { %1454 = vrot.lane.b32.xlu0 %v2523_v4, %s2777_s30 }
 0xece   :  { %v2104_v16 = vpop.eup %2103 }
 0xecf   :  { %v1135_v17 = vmul.f32 %v2104_v16, %v2102_v57 }
 0xed1   :  { %1969 = vmatmul.msk.f32.vlgmr.msrb.gmra.mxu0 %vm175_vm8, %v1135_v17 }
 0xed5   :  { %1539 = vrot.lane.b32.xlu0 %v2523_v4, %s2778_s23 }
 0xedd   :  { %1565 = vrot.lane.b32.xlu0 %v2538_v26, %s2779_s28 }
 0xedf   :  { %v1407_v32 = vpop.permute.xlu1 %1406 }
 0xf0c   :  { %v2618_v46 = vpop.f32.mrf.mxu1 }
 0xf11   :  { %v1249_v19 = vpop.xlane.xlu2 %1248 }
 0xf12   :  { %v1251_v20 = vsub.f32 %v1242_v8, %v1249_v19 }
 0xf14   :  { %v1254_v22 = vmul.f32 1.442695, %v1251_v20 }
 0xf16   :  { %2105 = vpow2.f32 %v1254_v22 }
 0xf19   :  { %v1405_v38 = vpop.permute.xlu2 %1404 }
 0xf1c   :  { %v2106_v23 = vpop.eup %2105 }
 0xf1d   :  { %v1259_v24 = vsel %vm175_vm8, %v2106_v23, 0.0 }
 0xf1e   :  { %1260 = vadd.xlane.f32.xlu1 %v1259_v24 }
 0xf24   :  { %v1434_v25 = vpop.xlane.xlu0 %1433 }
 0xf25   :  { %v1438_v27 = vsub.f32 %v1402_v13, %v1434_v25 }
 0xf27   :  { %v1440_v28 = vmul.f32 1.442695, %v1438_v27 }
 0xf29   :  { %2107 = vpow2.f32 %v1440_v28 }
 0xf2f   :  { %v2108_v0 = vpop.eup %2107 }
 0xf30   :  { %v1444_v30 = vsel %vm175_vm8, %v2108_v0, 0.0 }
 0xf31   :  { %1445 = vadd.xlane.f32.xlu2 %v1444_v30  ;;  %v1341_v30 = vpop.f32.mrf.mxu3 }
 0xf37   :  { %1567 = vrot.lane.b32.xlu1 %v2538_v26, %s2778_s23  ;;  %v1293_v31 = vpop.permute.xlu0 %1292 }
 0xf38   :  { %1313 = vmatpush.msra.mxu0 %v1293_v31 }
 0xf3a   :  { %1982 = vmatpush.xpose.msk.msrb.mxu0 %vm175_vm8, %v1407_v32 }
 0xf3f   :  { %v1455_v34 = vpop.permute.xlu0 %1454 }
 0xf40   :  { %1475 = vmatpush.msra.mxu2 %v1455_v34  ;;  %v1371_v34 = vadd.f32 %v2618_v46, %v1341_v30 }
 0xf47   :  { %v1540_v36 = vpop.permute.xlu0 %1539 }
 0xf48   :  { %1988 = vmatpush.xpose.msk.msrb.mxu1 %vm175_vm8, %v1540_v36 }
 0xf49   :  { %1537 = vrot.lane.b32.xlu2 %v2523_v4, %s2779_s28 }
 0xf4e   :  { %v1185_v37 = vpop.f32.mrf.mxu0 }
 0xf4f   :  { %1979 = vmatmul.msk.f32.gmra.mxu1 %vm175_vm8, %v1185_v37  ;;  %v1566_v43 = vpop.permute.xlu0 %1565 }
 0xf91   :  { %v1261_v33 = vpop.xlane.xlu1 %1260 }
 0xf92   :  { %2109 = vrcp.f32 %v1261_v33 }
 0xf98   :  { %v2110_v1 = vpop.eup %2109 }
 0xf99   :  { %v1265_v21 = vmul.f32 %v2110_v1, %v2106_v23  ;;  %v2040_v1 = vld [vmem:[%s2753_s7 + $0x1] ss:$0 sm:$0xff] }
 0xf9b   :  { %1975 = vmatmul.msk.f32.vlgmr.msra.gmra.mxu0 %vm175_vm8, %v1265_v21 }
 0xfa3   :  { %1983 = vmatmul.msk.f32.vlgmr.msrb.gmra.mxu0 %vm175_vm8, %v1405_v38 }
 0xfa4   :  { %v1446_v40 = vpop.xlane.xlu2 %1445 }
 0xfa5   :  { %2111 = vrcp.f32 %v1446_v40 }
 0xfa9   :  { %v1568_v55 = vpop.permute.xlu1 %1567 }
 0xfaa   :  { %1990 = vmatpush.xpose.msk.msrb.mxu2 %vm175_vm8, %v1568_v55 }
 0xfab   :  { %v2112_v41 = vpop.eup %2111 }
 0xfac   :  { %v1452_v42 = vmul.f32 %v2112_v41, %v2108_v0  ;;  %v1538_v35 = vpop.permute.xlu2 %1537 }
 0xfad   :  { %1989 = vmatmul.msk.f32.vlgmr.msrb.gmra.mxu1 %vm175_vm8, %v1538_v35 }
 0xfae   :  { %1984 = vmatmul.msk.f32.vlgmr.msra.gmra.mxu2 %vm175_vm8, %v1452_v42 }
 0xfb6   :  { %1991 = vmatmul.msk.f32.vlgmr.msrb.gmra.mxu2 %vm175_vm8, %v1566_v43 }
 0xfcc   :  { %v2621_v49 = vpop.f32.mrf.mxu1 }
0x1018   :  { %v1315_v45 = vpop.f32.mrf.mxu0 }
0x1019   :  { %1977 = vmatmul.msk.f32.gmra.mxu3 %vm175_vm8, %v1315_v45 }
0x1020   :  { %v1429_v47 = vpop.f32.mrf.mxu0 }
0x1021   :  { %v1430_v48 = vadd.f32 %v1429_v47, %v2314_v18 }
0x1023   :  { %v1435_v50 = vsel %vm175_vm8, %v1430_v48, -inf }
0x1024   :  { %1436 = vmax.xlane.f32.xlu1 %v1435_v50 }
0x102a   :  { %v1562_v51 = vpop.f32.mrf.mxu1 }
0x102b   :  { %v1563_v52 = vadd.f32 %v1562_v51, %v2304_v5 }
0x102d   :  { %v1593_v53 = vsel %vm175_vm8, %v1563_v52, -inf }
0x102e   :  { %1594 = vmax.xlane.f32.xlu2 %v1593_v53 }
0x1031   :  { %v1477_v54 = vpop.f32.mrf.mxu2 }
0x1032   :  { %1986 = vmatmul.msk.f32.vlgmr.msrb.gmra.mxu3 %vm175_vm8, %v1477_v54 }
0x1039   :  { %v1590_v56 = vpop.f32.mrf.mxu2 }
0x103a   :  { %v1591_v58 = vadd.f32 %v1590_v56, %v2314_v18  ;;  %v2002_v56 = vld [vmem:[%s2757_s10 + $0x38] sm:$0xff] }
0x103c   :  { %v1596_v59 = vsel %vm175_vm8, %v1591_v58, -inf }
0x103d   :  { %1597 = vmax.xlane.f32.xlu0 %v1596_v59  ;;  %v2000_v59 = vld [vmem:[%s2757_s10 + $0x28] sm:$0xff] }
0x1051   :  { %1480 = vrot.lane.b32.xlu0 %v2538_v26, %s2777_s30 }
0x1097   :  { %v1437_v60 = vpop.xlane.xlu1 %1436 }
0x1098   :  { %v1439_v61 = vsub.f32 %v1430_v48, %v1437_v60  ;;  %v1999_v60 = vld [vmem:[%s2757_s10 + $0x20] sm:$0xff] }
0x109a   :  { %v1442_v62 = vmul.f32 1.442695, %v1439_v61 }
0x109c   :  { %2113 = vpow2.f32 %v1442_v62  ;;  %v1344_v31 = vpop.f32.mrf.mxu3 }
0x109d   :  { %v1374_v41 = vadd.f32 %v2621_v49, %v1344_v31 }
0x10a1   :  { %v1595_v5 = vpop.xlane.xlu2 %1594 }
0x10a2   :  { %v2114_v57 = vpop.eup %2113  ;;  %v1599_v63 = vsub.f32 %v1563_v52, %v1595_v5 }
0x10a3   :  { %v1447_v2 = vsel %vm175_vm8, %v2114_v57, 0.0 }
0x10a4   :  { %v1601_v3 = vmul.f32 1.442695, %v1599_v63  ;;  %1448 = vadd.xlane.f32.xlu1 %v1447_v2 }
0x10a6   :  { %2115 = vpow2.f32 %v1601_v3 }
0x10ac   :  { %v2116_v6 = vpop.eup %2115 }
0x10ad   :  { %v1605_v18 = vsel %vm175_vm8, %v2116_v6, 0.0 }
0x10ae   :  { %1606 = vadd.xlane.f32.xlu2 %v1605_v18 }
0x10b0   :  { %v1598_v7 = vpop.xlane.xlu0 %1597 }
0x10b1   :  { %v1600_v8 = vsub.f32 %v1591_v58, %v1598_v7  ;;  %v2001_v58 = vld [vmem:[%s2757_s10 + $0x30] sm:$0xff]  ;;  %v2041_v7 = vld [vmem:[%s2754_s8 + $0x1] ss:$0 sm:$0xff] }
0x10b3   :  { %v1603_v9 = vmul.f32 1.442695, %v1600_v8 }
0x10b5   :  { %2117 = vpow2.f32 %v1603_v9  ;;  %v1529_v32 = vpop.f32.mrf.mxu3 }
0x10b6   :  { %v1535_v36 = vadd.f32 %v1529_v32, %v1371_v34  ;;  %v2008_v34 = vld [vmem:[%s2758_s12 + $0x50] sm:$0xff] }
0x10bb   :  { %v2118_v11 = vpop.eup %2117 }
0x10bc   :  { %v1608_v12 = vsel %vm175_vm8, %v2118_v11, 0.0 }
0x10bd   :  { %1609 = vadd.xlane.f32.xlu1 %v1608_v12 }
0x10c3   :  { %v1481_v13 = vpop.permute.xlu0 %1480 }
0x10c4   :  { %1501 = vmatpush.msra.mxu0 %v1481_v13 }
0x10c6   :  { %1615 = vrot.lane.b32.xlu2 %v2523_v4, %s2780_s18 }
0x10d6   :  { %1641 = vrot.lane.b32.xlu1 %v2538_v26, %s2780_s18  ;;  %v1963_v26 = vld [vmem:[%s2752_s6 + $0x38] sm:$0xff] }
0x10d7   :  { %1688 = vmatpush.msra.mxu2 %v1963_v26 }
0x1117   :  { %v1449_v14 = vpop.xlane.xlu1 %1448 }
0x1118   :  { %2119 = vrcp.f32 %v1449_v14  ;;  %v2013_v14 = vld [vmem:[%s2758_s12 + $0x78] sm:$0xff] }
0x1119   :  { %1834 = vmatpush.msra.mxu3 %v2013_v14 }
0x111e   :  { %v2120_v15 = vpop.eup %2119 }
0x111f   :  { %v1453_v16 = vmul.f32 %v2120_v15, %v2114_v57  ;;  %v2012_v15 = vld [vmem:[%s2758_s12 + $0x70] sm:$0xff] }
0x1120   :  { %1835 = vmatpush.msra.mxu3 %v2012_v15 }
0x1121   :  { %1985 = vmatmul.msk.f32.vlgmr.msra.gmra.mxu0 %vm175_vm8, %v1453_v16  ;;  %v1607_v17 = vpop.xlane.xlu2 %1606  ;;  %v2011_v16 = vld [vmem:[%s2758_s12 + $0x68] sm:$0xff] }
0x1122   :  { %2121 = vrcp.f32 %v1607_v17  ;;  %1836 = vmatpush.msra.mxu3 %v2011_v16 }
0x1128   :  { %v2122_v19 = vpop.eup %2121 }
0x1129   :  { %v1613_v20 = vmul.f32 %v2122_v19, %v2116_v6  ;;  %v1616_v22 = vpop.permute.xlu2 %1615 }
0x112a   :  { %1636 = vmatpush.msrb.mxu0 %v1616_v22 }
0x112b   :  { %1992 = vmatmul.msk.f32.vlgmr.msrb.gmra.mxu0 %vm175_vm8, %v1613_v20  ;;  %v2010_v20 = vld [vmem:[%s2758_s12 + $0x60] sm:$0xff] }
0x112c   :  { %1793 = vmatpush.msra.mxu0 %v2002_v56  ;;  %1837 = vmatpush.msra.mxu3 %v2010_v20 }
0x112e   :  { %1794 = vmatpush.msra.mxu0 %v2001_v58 }
0x1130   :  { %v1610_v23 = vpop.xlane.xlu1 %1609  ;;  %1795 = vmatpush.msra.mxu0 %v2000_v59 }
0x1131   :  { %2123 = vrcp.f32 %v1610_v23  ;;  %v2009_v23 = vld [vmem:[%s2758_s12 + $0x58] sm:$0xff] }
0x1132   :  { %1796 = vmatpush.msra.mxu0 %v1999_v60  ;;  %1838 = vmatpush.msra.mxu3 %v2009_v23 }
0x1134   :  { %1839 = vmatpush.msra.mxu3 %v2008_v34 }
0x1137   :  { %v2124_v4 = vpop.eup %2123 }
0x1138   :  { %v1614_v24 = vmul.f32 %v2124_v4, %v2118_v11  ;;  %v2042_v11 = vld [vmem:[%s2755_s9 + $0x1] ss:$0 sm:$0xff] }
0x1148   :  { %v1642_v25 = vpop.permute.xlu1 %1641 }
0x1149   :  { %1662 = vmatpush.msra.mxu1 %v1642_v25 }
0x114a   :  { %1993 = vmatmul.msk.f32.vlgmr.msra.gmra.mxu1 %vm175_vm8, %v1614_v24 }
0x119e   :  { %v1503_v27 = vpop.f32.mrf.mxu0 }
0x119f   :  { %1987 = vmatmul.msk.f32.gmra.mxu3 %vm175_vm8, %v1503_v27 }
0x11a8   :  { %v1638_v28 = vpop.f32.mrf.mxu0 }
0x11a9   :  { %1994 = vmatmul.msk.f32.vlgmr.msra.gmra.mxu2 %vm175_vm8, %v1638_v28 }
0x11c7   :  { %v1664_v0 = vpop.f32.mrf.mxu1 }
0x11c8   :  { %1995 = vmatmul.msk.f32.gmra.mxu2 %vm175_vm8, %v1664_v0 }
0x1222   :  { %v1532_v55 = vpop.f32.mrf.mxu3 }
0x1223   :  { %v1536_v42 = vadd.f32 %v1532_v55, %v1374_v41 }
0x122c   :  { %v1690_v37 = vpop.f32.mrf.mxu2 }
0x122d   :  { %v1696_v33 = vadd.f32 %v1690_v37, %v1535_v36  ;;  %v2007_v36 = vld [vmem:[%s2758_s12 + $0x48] sm:$0xff]  ;;  %v2006_v37 = vld [vmem:[%s2758_s12 + $0x40] sm:$0xff] }
0x122e   :  { %1840 = vmatpush.msra.mxu3 %v2007_v36 }
0x122f   :  { %v1698_v21 = vadd.f32 %v1696_v33, %v2484_v29  ;;  %v2043_v33 = vld [vmem:[%s2756_s11 + $0x1] ss:$0 sm:$0xff] }
0x1230   :  { %1841 = vmatpush.msra.mxu3 %v2006_v37 }
0x1231   :  { %v2652_v38 = vadd.f32 %v2040_v1, %v1698_v21 }
0x1233   :  { %v1711_v40 = vsel %vm63_vm0, %v2652_v38, 0.0 }
0x1234   :  { %1712 = vadd.xlane.f32.xlu0 %v1711_v40 }
0x124b   :  { %v1693_v35 = vpop.f32.mrf.mxu2 }
0x124c   :  { %v1697_v43 = vadd.f32 %v1693_v35, %v1536_v42  ;;  %v2044_v35 = vld [vmem:[%s2759_s13 + $0x1] ss:$0 sm:$0xff] }
0x124e   :  { %v1699_v44 = vadd.f32 %v1697_v43, %v2493_v39 }
0x1250   :  { %v2658_v45 = vadd.f32 %v2040_v1, %v1699_v44 }
0x1252   :  { %v1714_v46 = vsel %vm63_vm0, %v2658_v45, 0.0 }
0x1253   :  { %1715 = vadd.xlane.f32.xlu2 %v1714_v46 }
0x12a7   :  { %v1713_v29 = vpop.xlane.xlu0 %1712 }
0x12a8   :  { %v1717_v47 = vmul.f32 %v1713_v29, %v2244_v10 }
0x12aa   :  { %v1719_v48 = vsub.f32 %v2652_v38, %v1717_v47 }
0x12ac   :  { %v1721_v50 = vmul.f32 %v1719_v48, %v1719_v48 }
0x12ae   :  { %v1723_v51 = vsel %vm63_vm0, %v1721_v50, 0.0 }
0x12af   :  { %1724 = vadd.xlane.f32.xlu1 %v1723_v51 }
0x12c6   :  { %v1716_v49 = vpop.xlane.xlu2 %1715 }
0x12c7   :  { %v1718_v52 = vmul.f32 %v1716_v49, %v2244_v10 }
0x12c9   :  { %v1720_v39 = vsub.f32 %v2658_v45, %v1718_v52 }
0x12cb   :  { %v1722_v53 = vmul.f32 %v1720_v39, %v1720_v39 }
0x12cd   :  { %v1726_v54 = vsel %vm63_vm0, %v1722_v53, 0.0 }
0x12ce   :  { %1727 = vadd.xlane.f32.xlu0 %v1726_v54 }
0x1322   :  { %v1725_v61 = vpop.xlane.xlu1 %1724 }
0x1323   :  { %v1729_v62 = vmul.f32 %v1725_v61, %v2244_v10 }
0x1325   :  { %v1731_v5 = vadd.f32 1e-05, %v1729_v62 }
0x1327   :  { %2125 = vrsqrt.f32 %v1731_v5  ;;  %vm1739_vm8 = vweird.f32 %v1731_v5 }
0x132d   :  { %v2126_v57 = vpop.eup %2125 }
0x132e   :  { %v1734_v63 = vmul.f32 %v2126_v57, %v1731_v5  ;;  %vm1740_vm7 = vweird.f32 %v2126_v57 }
0x132f   :  { %vm1741_vm9 = vmor %vm1739_vm8, %vm1740_vm7 }
0x1330   :  { %v1735_v2 = vmul.f32 %v2126_v57, %v1734_v63 }
0x1332   :  { %v1736_v3 = vmul.f32 0.5, %v1735_v2 }
0x1334   :  { %v1737_v6 = vsub.f32 1.5, %v1736_v3 }
0x1336   :  { %v1738_v18 = vmul.f32 %v2126_v57, %v1737_v6 }
0x1338   :  { %v1742_v8 = vsel %vm1741_vm9, %v2126_v57, %v1738_v18  ;;  %v2045_v18 = vld [vmem:[%s2760_s14] ss:$0 sm:$0xff] }
0x1339   :  { %v1753_v9 = vmul.f32 %v1742_v8, %v1719_v48  ;;  %v2046_v8 = vld [vmem:[%s2761_s15] ss:$0 sm:$0xff] }
0x133b   :  { %v1758_v12 = vmul.f32 %v2041_v7, %v1753_v9 }
0x133d   :  { %v1763_v13 = vadd.f32 %v2042_v11, %v1758_v12 }
0x133f   :  { %2004 = vmatmul.msk.f32.vlgmr.msra.gmra.mxu0 %vm63_vm0, %v1763_v13 }
0x1341   :  { %v1728_v17 = vpop.xlane.xlu0 %1727 }
0x1342   :  { %v1730_v19 = vmul.f32 %v1728_v17, %v2244_v10 }
0x1344   :  { %v1732_v22 = vadd.f32 1e-05, %v1730_v19 }
0x1346   :  { %2127 = vrsqrt.f32 %v1732_v22  ;;  %vm1749_vm11 = vweird.f32 %v1732_v22 }
0x134c   :  { %v2128_v4 = vpop.eup %2127 }
0x134d   :  { %v1744_v24 = vmul.f32 %v2128_v4, %v1732_v22  ;;  %vm1750_vm10 = vweird.f32 %v2128_v4 }
0x134e   :  { %vm1751_vm13 = vmor %vm1749_vm11, %vm1750_vm10 }
0x134f   :  { %v1745_v25 = vmul.f32 %v2128_v4, %v1744_v24 }
0x1351   :  { %v1746_v26 = vmul.f32 0.5, %v1745_v25 }
0x1353   :  { %v1747_v27 = vsub.f32 1.5, %v1746_v26 }
0x1355   :  { %v1748_v28 = vmul.f32 %v2128_v4, %v1747_v27 }
0x1357   :  { %v1752_v0 = vsel %vm1751_vm13, %v2128_v4, %v1748_v28 }
0x1358   :  { %v1754_v30 = vmul.f32 %v1752_v0, %v1720_v39 }
0x135a   :  { %v1759_v31 = vmul.f32 %v2041_v7, %v1754_v30 }
0x135c   :  { %v1764_v32 = vadd.f32 %v2042_v11, %v1759_v31 }
0x135e   :  { %2005 = vmatmul.msk.f32.gmra.mxu0 %vm63_vm0, %v1764_v32 }
0x13bc   :  { %v1798_v1 = vpop.f32.mrf.mxu0 }
0x13bd   :  { %v1799_v21 = vadd.f32 %v2043_v33, %v1798_v1 }
0x13bf   :  { %v1804_v40 = vmax.f32 %v1799_v21, 0.0 }
0x13c1   :  { %2015 = vmatmul.msk.f32.vlgmr.msra.gmra.mxu3 %vm926_vm12, %v1804_v40 }
0x13db   :  { %v1801_v55 = vpop.f32.mrf.mxu0 }
0x13dc   :  { %v1802_v41 = vadd.f32 %v2043_v33, %v1801_v55 }
0x13de   :  { %v1805_v42 = vmax.f32 %v1802_v41, 0.0 }
0x13e0   :  { %2016 = vmatmul.msk.f32.gmra.mxu3 %vm926_vm12, %v1805_v42 }
0x1444   :  { %v1843_v43 = vpop.f32.mrf.mxu3 }
0x1445   :  { %v1844_v44 = vadd.f32 %v2044_v35, %v1843_v43 }
0x1447   :  { %v1849_v46 = vadd.f32 %v1844_v44, %v2652_v38 }
0x1449   :  { %v1853_v29 = vsel %vm63_vm0, %v1849_v46, 0.0 }
0x144a   :  { %1854 = vadd.xlane.f32.xlu0 %v1853_v29 }
0x1463   :  { %v1846_v47 = vpop.f32.mrf.mxu3 }
0x1464   :  { %v1847_v48 = vadd.f32 %v2044_v35, %v1846_v47 }
0x1466   :  { %v1850_v50 = vadd.f32 %v1847_v48, %v2658_v45 }
0x1468   :  { %v1856_v51 = vsel %vm63_vm0, %v1850_v50, 0.0 }
0x1469   :  { %1857 = vadd.xlane.f32.xlu2 %v1856_v51 }
0x14bd   :  { %v1855_v49 = vpop.xlane.xlu0 %1854 }
0x14be   :  { %v1859_v52 = vmul.f32 %v1855_v49, %v2244_v10 }
0x14c0   :  { %v1861_v39 = vsub.f32 %v1849_v46, %v1859_v52 }
0x14c2   :  { %v1863_v53 = vmul.f32 %v1861_v39, %v1861_v39 }
0x14c4   :  { %v1865_v54 = vsel %vm63_vm0, %v1863_v53, 0.0 }
0x14c5   :  { %1866 = vadd.xlane.f32.xlu1 %v1865_v54 }
0x14dc   :  { %v1858_v56 = vpop.xlane.xlu2 %1857 }
0x14dd   :  { %v1860_v38 = vmul.f32 %v1858_v56, %v2244_v10 }
0x14df   :  { %v1862_v58 = vsub.f32 %v1850_v50, %v1860_v38 }
0x14e1   :  { %v1864_v59 = vmul.f32 %v1862_v58, %v1862_v58 }
0x14e3   :  { %v1868_v60 = vsel %vm63_vm0, %v1864_v59, 0.0 }
0x14e4   :  { %1869 = vadd.xlane.f32.xlu0 %v1868_v60 }
0x1538   :  { %v1867_v45 = vpop.xlane.xlu1 %1866 }
0x1539   :  { %v1871_v61 = vmul.f32 %v1867_v45, %v2244_v10 }
0x153b   :  { %v1873_v62 = vadd.f32 1e-05, %v1871_v61 }
0x153d   :  { %2129 = vrsqrt.f32 %v1873_v62  ;;  %vm1881_vm14 = vweird.f32 %v1873_v62 }
0x1543   :  { %v2130_v5 = vpop.eup %2129 }
0x1544   :  { %v1876_v57 = vmul.f32 %v2130_v5, %v1873_v62  ;;  %vm1882_vm12 = vweird.f32 %v2130_v5 }
0x1545   :  { %vm1883_vm15 = vmor %vm1881_vm14, %vm1882_vm12 }
0x1546   :  { %v1877_v63 = vmul.f32 %v2130_v5, %v1876_v57 }
0x1548   :  { %v1878_v2 = vmul.f32 0.5, %v1877_v63 }
0x154a   :  { %v1879_v3 = vsub.f32 1.5, %v1878_v2 }
0x154c   :  { %v1880_v6 = vmul.f32 %v2130_v5, %v1879_v3 }
0x154e   :  { %v1884_v7 = vsel %vm1883_vm15, %v2130_v5, %v1880_v6 }
0x154f   :  { %v1895_v9 = vmul.f32 %v1884_v7, %v1861_v39 }
0x1551   :  { %v1900_v11 = vmul.f32 %v2045_v18, %v1895_v9 }
0x1553   :  { %v1905_v12 = vadd.f32 %v2046_v8, %v1900_v11 }
0x1555   :  { %1907 = vst.msk [vmem:[%s2762_s16] sm:$0xff] %vm63_vm0, %v1905_v12 }
0x1557   :  { %v1870_v13 = vpop.xlane.xlu0 %1869 }
0x1558   :  { %v1872_v14 = vmul.f32 %v1870_v13, %v2244_v10 }
0x155a   :  { %v1874_v15 = vadd.f32 1e-05, %v1872_v14 }
0x155c   :  { %2131 = vrsqrt.f32 %v1874_v15  ;;  %vm1891_vm2 = vweird.f32 %v1874_v15 }
0x1562   :  { %v2132_v16 = vpop.eup %2131 }
0x1563   :  { %v1886_v17 = vmul.f32 %v2132_v16, %v1874_v15  ;;  %vm1892_vm1 = vweird.f32 %v2132_v16 }
0x1564   :  { %vm1893_vm3 = vmor %vm1891_vm2, %vm1892_vm1 }
0x1565   :  { %v1887_v19 = vmul.f32 %v2132_v16, %v1886_v17 }
0x1567   :  { %v1888_v20 = vmul.f32 0.5, %v1887_v19 }
0x1569   :  { %v1889_v22 = vsub.f32 1.5, %v1888_v20 }
0x156b   :  { %v1890_v23 = vmul.f32 %v2132_v16, %v1889_v22 }
0x156d   :  { %v1894_v4 = vsel %vm1893_vm3, %v2132_v16, %v1890_v23 }
0x156e   :  { %v1896_v24 = vmul.f32 %v1894_v4, %v1862_v58 }
0x1570   :  { %v1901_v25 = vmul.f32 %v2045_v18, %v1896_v24 }
0x1572   :  { %v1906_v26 = vadd.f32 %v2046_v8, %v1901_v25 }
0x1574   :  { %1908 = vst.msk [vmem:[%s2762_s16 + $0x8] sm:$0xff] %vm63_vm0, %v1906_v26 }

</bundles_post_ra>
